<compile_context>
chip_gen: v7x
topology: tpu7x:2x2x1
jax: 0.10.0
libtpu: 0.0.40
codegen_flags: <defaults>
</compile_context>

<pallas_src>
import functools
import math

import jax
import jax.numpy as jnp
from jax import lax
from jax.experimental import pallas as pl
from jax.experimental.pallas import tpu as pltpu

LATENT_DIM = 2
# (in_features, out_features) for each Linear layer, encoder then decoder.
LAYER_DIMS = [
    (15, 6), (6, 6), (6, 6), (6, LATENT_DIM),          # encoder
    (LATENT_DIM, 6), (6, 6), (6, 6), (6, 15),          # decoder
]
NUM_LAYERS = len(LAYER_DIMS)      # 8
NUM_HIDDEN = NUM_LAYERS - 2       # 6 hidden (6->6-ish) layers: indices 1..6
IN_DIM = LAYER_DIMS[0][0]         # 15
OUT_DIM = LAYER_DIMS[-1][1]       # 15
F_PAD = 16                        # first/last layer feature width, padded
H_PAD = 8                         # hidden widths (<= 6), padded to sublane count

# Padded per-sample work (advisory cost estimate only).
_PAD_MACS = H_PAD * F_PAD + NUM_HIDDEN * H_PAD * H_PAD + F_PAD * H_PAD   # 640
_PAD_TRANS = (NUM_LAYERS - 1) * H_PAD + F_PAD                            # 72


def _autoencoder_kernel(x_ref, wt1_ref, b1_ref, wth_ref, bh_ref, wt8_ref, b8_ref,
                        out_ref):
    """Full 8-layer MLP on one feature-major (F_PAD, block_b) batch tile.

    Batch lives on the 128-lane axis everywhere: matmuls, bias adds, sin/sigmoid
    and the final store all operate on full vregs (no masked vst, no XLU transpose).
    Hidden activations are carried as (8, block_b) to halve padded EUP (sin) work.
    Zero-padded weight/bias rows + sin(0)==0 keep padded rows exactly 0 throughout.
    """
    x = x_ref[...]                                                  # (16, block_b)

    # Layer 1: (8,16) @ (16,B) -> (8,B). The zero 16th weight column makes the
    # padded feature row a no-op (no in-kernel weight lane-slice needed).
    h = jnp.dot(wt1_ref[...], x, preferred_element_type=jnp.float32)
    h = jnp.sin(h + b1_ref[...])                                    # (8,1) bias bcast

    # Layers 2..7: (8,8) @ (8,B) + Sin(). Static 6-iteration unrolled loop.
    for l in range(NUM_HIDDEN):
        h = jnp.dot(wth_ref[l], h, preferred_element_type=jnp.float32)
        h = jnp.sin(h + bh_ref[l])

    # Layer 8 + Sigmoid(): (16,8) @ (8,B) -> (16,B), stored feature-major
    # (row 15 is padding = sigmoid(0), sliced off in the wrapper).
    h = jnp.dot(wt8_ref[...], h, preferred_element_type=jnp.float32) + b8_ref[...]
    out_ref[...] = jax.nn.sigmoid(h)


def make_params(key):
    """Deterministic PyTorch-style init: U(-1/sqrt(fan_in), 1/sqrt(fan_in))."""
    params = []
    for fan_in, fan_out in LAYER_DIMS:
        key, kw, kb = jax.random.split(key, 3)
        bound = 1.0 / math.sqrt(fan_in)
        w = jax.random.uniform(kw, (fan_in, fan_out), jnp.float32, -bound, bound)
        b = jax.random.uniform(kb, (fan_out,), jnp.float32, -bound, bound)
        params.append((w, b))
    return params


def pack_params(params):
    """Zero-pad + transpose weights into MXU-friendly, VMEM-resident slabs.

    wt1 (8,16),  b1 (8,1)    : layer 1  (15 -> 6)
    wth (6,8,8), bh (6,8,1)  : layers 2..7 (<=6 -> <=6)
    wt8 (16,8),  b8 (16,1)   : layer 8  (6 -> 15)
    """
    (w1, bias1), hidden, (w8, bias8) = params[0], params[1:-1], params[-1]

    wt1 = jnp.zeros((H_PAD, F_PAD), jnp.float32)
    wt1 = wt1.at[:w1.shape[1], :w1.shape[0]].set(w1.T)
    b1 = jnp.zeros((H_PAD, 1), jnp.float32).at[:bias1.shape[0], 0].set(bias1)

    wth = jnp.zeros((NUM_HIDDEN, H_PAD, H_PAD), jnp.float32)
    bh = jnp.zeros((NUM_HIDDEN, H_PAD, 1), jnp.float32)
    for l, (w, b) in enumerate(hidden):
        wth = wth.at[l, :w.shape[1], :w.shape[0]].set(w.T)
        bh = bh.at[l, :b.shape[0], 0].set(b)

    wt8 = jnp.zeros((F_PAD, H_PAD), jnp.float32)
    wt8 = wt8.at[:w8.shape[1], :w8.shape[0]].set(w8.T)
    b8 = jnp.zeros((F_PAD, 1), jnp.float32).at[:bias8.shape[0], 0].set(bias8)

    return wt1, b1, wth, bh, wt8, b8


def _round_up(n, m):
    return ((n + m - 1) // m) * m


def _choose_block_b(batch, requested):
    """Lane-aligned batch tile: amortize step overhead, keep >= 2 grid steps."""
    bb = _round_up(max(requested, 128), 128)
    bb = min(bb, _round_up(batch, 128))
    # Keep at least 2 grid steps when the batch allows it so "parallel" can feed
    # both v7x TensorCores; a single extra step is harmless on v5e/v6e.
    half = _round_up(-(-batch // 2), 128)
    return max(min(bb, half), 128)


def _autoencoder_fm_call(x_fm, wt1, b1, wth, bh, wt8, b8, block_b):
    """Feature-major fast path: x_fm (16, batch_p) -> out_fm (16, batch_p)."""
    batch_p = x_fm.shape[1]
    grid = (batch_p // block_b,)

    param_bytes = 4 * (wt1.size + b1.size + wth.size + bh.size + wt8.size + b8.size)
    cost = pl.CostEstimate(
        flops=2 * batch_p * _PAD_MACS,
        transcendentals=batch_p * _PAD_TRANS,
        bytes_accessed=batch_p * 2 * F_PAD * 4 + param_bytes,
    )

    const2 = lambda i: (0, 0)
    const3 = lambda i: (0, 0, 0)

    return pl.pallas_call(
        _autoencoder_kernel,
        out_shape=jax.ShapeDtypeStruct((F_PAD, batch_p), jnp.float32),
        grid=grid,
        in_specs=[
            pl.BlockSpec((F_PAD, block_b), lambda i: (0, i)),           # x tile (lane-dense)
            pl.BlockSpec((H_PAD, F_PAD), const2),                       # layer-1 W^T (resident)
            pl.BlockSpec((H_PAD, 1), const2),                           # layer-1 bias
            pl.BlockSpec((NUM_HIDDEN, H_PAD, H_PAD), const3),           # hidden W^T slab
            pl.BlockSpec((NUM_HIDDEN, H_PAD, 1), const3),               # hidden bias slab
            pl.BlockSpec((F_PAD, H_PAD), const2),                       # layer-8 W^T
            pl.BlockSpec((F_PAD, 1), const2),                           # layer-8 bias
        ],
        out_specs=pl.BlockSpec((F_PAD, block_b), lambda i: (0, i)),     # lane-dense store
        compiler_params=pltpu.CompilerParams(
            dimension_semantics=("parallel",),
            vmem_limit_bytes=32 * 1024 * 1024,     # ~2 MiB actually used at block_b=8192
        ),
        cost_estimate=cost,
    )(x_fm, wt1, b1, wth, bh, wt8, b8)


@functools.partial(jax.jit, static_argnames=("block_b",))
def autoencoder_forward(x, wt1, b1, wth, bh, wt8, b8, *, block_b=8192):
    """Module-semantics wrapper: x (batch, 15) f32 -> decoded (batch, 15) f32.

    The kernel itself is feature-major (batch on the lane axis); the pad /
    transpose / slice here is XLA-side layout plumbing only.
    """
    batch = x.shape[0]
    bb = _choose_block_b(batch, block_b)
    batch_p = _round_up(batch, bb)

    # Pad features 15 -> 16 and batch -> batch_p, transpose to feature-major.
    x_fm = jnp.zeros((F_PAD, batch_p), jnp.float32).at[:IN_DIM, :batch].set(x.T)

    out_fm = _autoencoder_fm_call(x_fm, wt1, b1, wth, bh, wt8, b8, bb)
    return out_fm[:OUT_DIM, :batch].T


def reference_forward(x, params):
    h = x
    for i, (w, b) in enumerate(params):
        h = jnp.dot(h, w, precision=lax.Precision.HIGHEST) + b
        h = jnp.sin(h) if i < NUM_LAYERS - 1 else jax.nn.sigmoid(h)
    return h


if __name__ == "__main__":
    key = jax.random.PRNGKey(0)
    key, kx = jax.random.split(key)

    batch = 512                      # small demo; block tile clamps to 256 -> 2 grid steps
    x = jax.random.normal(kx, (batch, IN_DIM), jnp.float32)

    params = make_params(key)
    packed = pack_params(params)

    out = autoencoder_forward(x, *packed)
    out = jax.block_until_ready(out)

    ref = reference_forward(x, params)
    assert out.shape == (batch, OUT_DIM)
    # f32 everywhere; tolerance covers MXU / summation-order differences across 8 layers.
    assert jnp.allclose(out, ref, atol=1e-4, rtol=1e-4), float(jnp.max(jnp.abs(out - ref)))

    print("KERNEL_OK")
</pallas_src>

<mosaic_0001>
module attributes {stable_mosaic.version = 11 : i64} {
  func.func @_autoencoder_kernel(%arg0: i32, %arg1: memref<16x256xf32, #tpu.memory_space<vmem>>, %arg2: memref<8x16xf32, #tpu.memory_space<vmem>>, %arg3: memref<8x1xf32, #tpu.memory_space<vmem>>, %arg4: memref<6x8x8xf32, #tpu.memory_space<vmem>>, %arg5: memref<6x8x1xf32, #tpu.memory_space<vmem>>, %arg6: memref<16x8xf32, #tpu.memory_space<vmem>>, %arg7: memref<16x1xf32, #tpu.memory_space<vmem>>, %arg8: memref<16x256xf32, #tpu.memory_space<vmem>>) attributes {dimension_semantics = [#tpu.dimension_semantics<parallel>], iteration_bounds = array<i64: 2>, scalar_prefetch = 0 : i64, scratch_operands = 0 : i64, tpu.core_type = #tpu.core_type<tc>, window_params = [{transform_indices = @transform_0, window_bounds = array<i64: 16, 256>}, {pipeline_mode = #tpu.pipeline_mode<synchronous>, transform_indices = @transform_1, window_bounds = array<i64: 8, 16>}, {pipeline_mode = #tpu.pipeline_mode<synchronous>, transform_indices = @transform_2, window_bounds = array<i64: 8, 1>}, {pipeline_mode = #tpu.pipeline_mode<synchronous>, transform_indices = @transform_3, window_bounds = array<i64: 6, 8, 8>}, {pipeline_mode = #tpu.pipeline_mode<synchronous>, transform_indices = @transform_4, window_bounds = array<i64: 6, 8, 1>}, {pipeline_mode = #tpu.pipeline_mode<synchronous>, transform_indices = @transform_5, window_bounds = array<i64: 16, 8>}, {pipeline_mode = #tpu.pipeline_mode<synchronous>, transform_indices = @transform_6, window_bounds = array<i64: 16, 1>}, {transform_indices = @transform_7, window_bounds = array<i64: 16, 256>}]} {
    %c0 = arith.constant 0 : index
    %c0_0 = arith.constant 0 : index
    %0 = vector.load %arg1[%c0, %c0_0] : memref<16x256xf32, #tpu.memory_space<vmem>>, vector<16x256xf32>
    %c0_1 = arith.constant 0 : index
    %c0_2 = arith.constant 0 : index
    %1 = vector.load %arg2[%c0_1, %c0_2] : memref<8x16xf32, #tpu.memory_space<vmem>>, vector<8x16xf32>
    %cst = arith.constant dense<0.000000e+00> : vector<8x256xf32>
    %2 = tpu.matmul %1, %0, %cst {dimension_numbers = #tpu.dot_dimension_numbers<[1], [0], [0], [1], [0, 0, 1, 1], [], []>} : vector<8x16xf32>, vector<16x256xf32>, vector<8x256xf32> -> vector<8x256xf32>
    %c0_3 = arith.constant 0 : index
    %c0_4 = arith.constant 0 : index
    %3 = vector.load %arg3[%c0_3, %c0_4] : memref<8x1xf32, #tpu.memory_space<vmem>>, vector<8x1xf32>
    %4 = vector.broadcast %3 : vector<8x1xf32> to vector<8x256xf32>
    %5 = arith.addf %2, %4 : vector<8x256xf32>
    %6 = math.sin %5 : vector<8x256xf32>
    %c0_5 = arith.constant 0 : index
    %c0_6 = arith.constant 0 : index
    %c0_7 = arith.constant 0 : index
    %7 = vector.load %arg4[%c0_5, %c0_6, %c0_7] : memref<6x8x8xf32, #tpu.memory_space<vmem>>, vector<1x8x8xf32>
    %8 = vector.shape_cast %7 : vector<1x8x8xf32> to vector<8x8xf32>
    %cst_8 = arith.constant dense<0.000000e+00> : vector<8x256xf32>
    %9 = tpu.matmul %8, %6, %cst_8 {dimension_numbers = #tpu.dot_dimension_numbers<[1], [0], [0], [1], [0, 0, 1, 1], [], []>} : vector<8x8xf32>, vector<8x256xf32>, vector<8x256xf32> -> vector<8x256xf32>
    %c0_9 = arith.constant 0 : index
    %c0_10 = arith.constant 0 : index
    %c0_11 = arith.constant 0 : index
    %10 = vector.load %arg5[%c0_9, %c0_10, %c0_11] : memref<6x8x1xf32, #tpu.memory_space<vmem>>, vector<1x8x1xf32>
    %11 = vector.shape_cast %10 : vector<1x8x1xf32> to vector<8x1xf32>
    %12 = vector.broadcast %11 : vector<8x1xf32> to vector<8x256xf32>
    %13 = arith.addf %9, %12 : vector<8x256xf32>
    %14 = math.sin %13 : vector<8x256xf32>
    %c1 = arith.constant 1 : index
    %c0_12 = arith.constant 0 : index
    %c0_13 = arith.constant 0 : index
    %15 = vector.load %arg4[%c1, %c0_12, %c0_13] : memref<6x8x8xf32, #tpu.memory_space<vmem>>, vector<1x8x8xf32>
    %16 = vector.shape_cast %15 : vector<1x8x8xf32> to vector<8x8xf32>
    %cst_14 = arith.constant dense<0.000000e+00> : vector<8x256xf32>
    %17 = tpu.matmul %16, %14, %cst_14 {dimension_numbers = #tpu.dot_dimension_numbers<[1], [0], [0], [1], [0, 0, 1, 1], [], []>} : vector<8x8xf32>, vector<8x256xf32>, vector<8x256xf32> -> vector<8x256xf32>
    %c1_15 = arith.constant 1 : index
    %c0_16 = arith.constant 0 : index
    %c0_17 = arith.constant 0 : index
    %18 = vector.load %arg5[%c1_15, %c0_16, %c0_17] : memref<6x8x1xf32, #tpu.memory_space<vmem>>, vector<1x8x1xf32>
    %19 = vector.shape_cast %18 : vector<1x8x1xf32> to vector<8x1xf32>
    %20 = vector.broadcast %19 : vector<8x1xf32> to vector<8x256xf32>
    %21 = arith.addf %17, %20 : vector<8x256xf32>
    %22 = math.sin %21 : vector<8x256xf32>
    %c2 = arith.constant 2 : index
    %c0_18 = arith.constant 0 : index
    %c0_19 = arith.constant 0 : index
    %23 = vector.load %arg4[%c2, %c0_18, %c0_19] : memref<6x8x8xf32, #tpu.memory_space<vmem>>, vector<1x8x8xf32>
    %24 = vector.shape_cast %23 : vector<1x8x8xf32> to vector<8x8xf32>
    %cst_20 = arith.constant dense<0.000000e+00> : vector<8x256xf32>
    %25 = tpu.matmul %24, %22, %cst_20 {dimension_numbers = #tpu.dot_dimension_numbers<[1], [0], [0], [1], [0, 0, 1, 1], [], []>} : vector<8x8xf32>, vector<8x256xf32>, vector<8x256xf32> -> vector<8x256xf32>
    %c2_21 = arith.constant 2 : index
    %c0_22 = arith.constant 0 : index
    %c0_23 = arith.constant 0 : index
    %26 = vector.load %arg5[%c2_21, %c0_22, %c0_23] : memref<6x8x1xf32, #tpu.memory_space<vmem>>, vector<1x8x1xf32>
    %27 = vector.shape_cast %26 : vector<1x8x1xf32> to vector<8x1xf32>
    %28 = vector.broadcast %27 : vector<8x1xf32> to vector<8x256xf32>
    %29 = arith.addf %25, %28 : vector<8x256xf32>
    %30 = math.sin %29 : vector<8x256xf32>
    %c3 = arith.constant 3 : index
    %c0_24 = arith.constant 0 : index
    %c0_25 = arith.constant 0 : index
    %31 = vector.load %arg4[%c3, %c0_24, %c0_25] : memref<6x8x8xf32, #tpu.memory_space<vmem>>, vector<1x8x8xf32>
    %32 = vector.shape_cast %31 : vector<1x8x8xf32> to vector<8x8xf32>
    %cst_26 = arith.constant dense<0.000000e+00> : vector<8x256xf32>
    %33 = tpu.matmul %32, %30, %cst_26 {dimension_numbers = #tpu.dot_dimension_numbers<[1], [0], [0], [1], [0, 0, 1, 1], [], []>} : vector<8x8xf32>, vector<8x256xf32>, vector<8x256xf32> -> vector<8x256xf32>
    %c3_27 = arith.constant 3 : index
    %c0_28 = arith.constant 0 : index
    %c0_29 = arith.constant 0 : index
    %34 = vector.load %arg5[%c3_27, %c0_28, %c0_29] : memref<6x8x1xf32, #tpu.memory_space<vmem>>, vector<1x8x1xf32>
    %35 = vector.shape_cast %34 : vector<1x8x1xf32> to vector<8x1xf32>
    %36 = vector.broadcast %35 : vector<8x1xf32> to vector<8x256xf32>
    %37 = arith.addf %33, %36 : vector<8x256xf32>
    %38 = math.sin %37 : vector<8x256xf32>
    %c4 = arith.constant 4 : index
    %c0_30 = arith.constant 0 : index
    %c0_31 = arith.constant 0 : index
    %39 = vector.load %arg4[%c4, %c0_30, %c0_31] : memref<6x8x8xf32, #tpu.memory_space<vmem>>, vector<1x8x8xf32>
    %40 = vector.shape_cast %39 : vector<1x8x8xf32> to vector<8x8xf32>
    %cst_32 = arith.constant dense<0.000000e+00> : vector<8x256xf32>
    %41 = tpu.matmul %40, %38, %cst_32 {dimension_numbers = #tpu.dot_dimension_numbers<[1], [0], [0], [1], [0, 0, 1, 1], [], []>} : vector<8x8xf32>, vector<8x256xf32>, vector<8x256xf32> -> vector<8x256xf32>
    %c4_33 = arith.constant 4 : index
    %c0_34 = arith.constant 0 : index
    %c0_35 = arith.constant 0 : index
    %42 = vector.load %arg5[%c4_33, %c0_34, %c0_35] : memref<6x8x1xf32, #tpu.memory_space<vmem>>, vector<1x8x1xf32>
    %43 = vector.shape_cast %42 : vector<1x8x1xf32> to vector<8x1xf32>
    %44 = vector.broadcast %43 : vector<8x1xf32> to vector<8x256xf32>
    %45 = arith.addf %41, %44 : vector<8x256xf32>
    %46 = math.sin %45 : vector<8x256xf32>
    %c5 = arith.constant 5 : index
    %c0_36 = arith.constant 0 : index
    %c0_37 = arith.constant 0 : index
    %47 = vector.load %arg4[%c5, %c0_36, %c0_37] : memref<6x8x8xf32, #tpu.memory_space<vmem>>, vector<1x8x8xf32>
    %48 = vector.shape_cast %47 : vector<1x8x8xf32> to vector<8x8xf32>
    %cst_38 = arith.constant dense<0.000000e+00> : vector<8x256xf32>
    %49 = tpu.matmul %48, %46, %cst_38 {dimension_numbers = #tpu.dot_dimension_numbers<[1], [0], [0], [1], [0, 0, 1, 1], [], []>} : vector<8x8xf32>, vector<8x256xf32>, vector<8x256xf32> -> vector<8x256xf32>
    %c5_39 = arith.constant 5 : index
    %c0_40 = arith.constant 0 : index
    %c0_41 = arith.constant 0 : index
    %50 = vector.load %arg5[%c5_39, %c0_40, %c0_41] : memref<6x8x1xf32, #tpu.memory_space<vmem>>, vector<1x8x1xf32>
    %51 = vector.shape_cast %50 : vector<1x8x1xf32> to vector<8x1xf32>
    %52 = vector.broadcast %51 : vector<8x1xf32> to vector<8x256xf32>
    %53 = arith.addf %49, %52 : vector<8x256xf32>
    %54 = math.sin %53 : vector<8x256xf32>
    %c0_42 = arith.constant 0 : index
    %c0_43 = arith.constant 0 : index
    %55 = vector.load %arg6[%c0_42, %c0_43] : memref<16x8xf32, #tpu.memory_space<vmem>>, vector<16x8xf32>
    %cst_44 = arith.constant dense<0.000000e+00> : vector<16x256xf32>
    %56 = tpu.matmul %55, %54, %cst_44 {dimension_numbers = #tpu.dot_dimension_numbers<[1], [0], [0], [1], [0, 0, 1, 1], [], []>} : vector<16x8xf32>, vector<8x256xf32>, vector<16x256xf32> -> vector<16x256xf32>
    %c0_45 = arith.constant 0 : index
    %c0_46 = arith.constant 0 : index
    %57 = vector.load %arg7[%c0_45, %c0_46] : memref<16x1xf32, #tpu.memory_space<vmem>>, vector<16x1xf32>
    %58 = vector.broadcast %57 : vector<16x1xf32> to vector<16x256xf32>
    %59 = arith.addf %56, %58 : vector<16x256xf32>
    %60 = arith.negf %59 : vector<16x256xf32>
    %61 = math.exp %60 : vector<16x256xf32>
    %cst_47 = arith.constant 1.000000e+00 : f32
    %62 = vector.broadcast %cst_47 : f32 to vector<16x256xf32>
    %63 = arith.addf %62, %61 : vector<16x256xf32>
    %64 = arith.divf %62, %63 : vector<16x256xf32>
    %c0_48 = arith.constant 0 : index
    %c0_49 = arith.constant 0 : index
    %65 = vector.load %arg8[%c0_48, %c0_49] : memref<16x256xf32, #tpu.memory_space<vmem>>, vector<16x256xf32>
    tpu.vector_store %arg8[%c0_48, %c0_49], %64 {strides = array<i32>} : memref<16x256xf32, #tpu.memory_space<vmem>>, vector<16x256xf32>,
    return
  }
  func.func @transform_0(%arg0: i32) -> (i32, i32) {
    %c0_i32 = arith.constant 0 : i32
    %c0_i32_0 = arith.constant 0 : i32
    return %c0_i32, %arg0 : i32, i32
  }
  func.func @transform_1(%arg0: i32) -> (i32, i32) {
    %c0_i32 = arith.constant 0 : i32
    %c0_i32_0 = arith.constant 0 : i32
    %c0_i32_1 = arith.constant 0 : i32
    return %c0_i32, %c0_i32_0 : i32, i32
  }
  func.func @transform_2(%arg0: i32) -> (i32, i32) {
    %c0_i32 = arith.constant 0 : i32
    %c0_i32_0 = arith.constant 0 : i32
    %c0_i32_1 = arith.constant 0 : i32
    return %c0_i32, %c0_i32_0 : i32, i32
  }
  func.func @transform_3(%arg0: i32) -> (i32, i32, i32) {
    %c0_i32 = arith.constant 0 : i32
    %c0_i32_0 = arith.constant 0 : i32
    %c0_i32_1 = arith.constant 0 : i32
    %c0_i32_2 = arith.constant 0 : i32
    return %c0_i32, %c0_i32_0, %c0_i32_1 : i32, i32, i32
  }
  func.func @transform_4(%arg0: i32) -> (i32, i32, i32) {
    %c0_i32 = arith.constant 0 : i32
    %c0_i32_0 = arith.constant 0 : i32
    %c0_i32_1 = arith.constant 0 : i32
    %c0_i32_2 = arith.constant 0 : i32
    return %c0_i32, %c0_i32_0, %c0_i32_1 : i32, i32, i32
  }
  func.func @transform_5(%arg0: i32) -> (i32, i32) {
    %c0_i32 = arith.constant 0 : i32
    %c0_i32_0 = arith.constant 0 : i32
    %c0_i32_1 = arith.constant 0 : i32
    return %c0_i32, %c0_i32_0 : i32, i32
  }
  func.func @transform_6(%arg0: i32) -> (i32, i32) {
    %c0_i32 = arith.constant 0 : i32
    %c0_i32_0 = arith.constant 0 : i32
    %c0_i32_1 = arith.constant 0 : i32
    return %c0_i32, %c0_i32_0 : i32, i32
  }
  func.func @transform_7(%arg0: i32) -> (i32, i32) {
    %c0_i32 = arith.constant 0 : i32
    %c0_i32_0 = arith.constant 0 : i32
    return %c0_i32, %arg0 : i32, i32
  }
}

</mosaic_0001>

<bundles_post_ra>
// kernel: autoencoder_forward.1
= control target key start
LH: loop header
LB: loop body
LE: loop exit
PB: predicated region body
PF: predicated region fallthrough
CT: control target
= control target key end

     0   :  { %s2888_s24 = smov 0   ;;  %s2890_s25 = smov 0   ;;  %s3620_s0 = inlined_call_operand.vmem [shape: f32[16,512], index: 0, kind: input, shape index: {}]   ;;  %s3621_s1 = inlined_call_operand.vmem [shape: f32[8,16], index: 1, kind: input, shape index: {}]   ;;  %s3622_s2 = inlined_call_operand.vmem [shape: f32[8,1], index: 2, kind: input, shape index: {}]   ;;  %s3623_s3 = inlined_call_operand.vmem [shape: f32[6,8,8], index: 3, kind: input, shape index: {}]   ;;  %s3624_s4 = inlined_call_operand.vmem [shape: f32[6,8,1], index: 4, kind: input, shape index: {}]   ;;  %s3625_s5 = inlined_call_operand.vmem [shape: f32[16,8], index: 5, kind: input, shape index: {}]   ;;  %s3626_s6 = inlined_call_operand.vmem [shape: f32[16,1], index: 6, kind: input, shape index: {}]   ;;  %s3627_s7 = inlined_call_operand.vmem [shape: f32[16,512], index: 7, kind: output, shape index: {}]  }
   0x1   :  { %s2892_s26 = smov 0  }
   0x2 LB: > { %s2554_s27 = sadd.s32 4294967295, %s2838_s26   ;;  %s2905_s28 = sadd.s32 1, %s2838_s26   ;;  %s2838_s26 = sphi %s2892_s26, %s3631_s26   ;;  %s2834_s25 = sphi %s2890_s25, %s3630_s25   ;;  %s2830_s24 = sphi %s2888_s24, %s3629_s24  }
   0x3   : > { %s21_s29 = ssub.s32 %s2838_s26, %s2905_s28  ;;  %s24_s30 = sadd.s32 1, %s2834_s25 }
   0x4   : > { %p22_p0 = scmp.eq.s32.totalorder %s21_s29, 0  ;;  %p31_p1 = scmp.ne.s32.totalorder %s2834_s25, %s2830_s24 }
   0x5   : > { %p32_p2 = scmp.eq.s32.totalorder %s2838_s26, 0  ;;  %p187_p3 = scmp.eq.s32.totalorder %s2554_s27, 1 }
   0x6   : > { %s2916_s8 = scalar_select %p22_p0, %s2834_s25, %s24_s30  }
   0x7   : > { %p33_p4 = por %p32_p2, %p31_p1  ;;  %p2918_p5 = por %p187_p3, %p31_p1 }
   0x8   : > { %p2557_p6 = scmp.ge.s32.totalorder %s2838_s26, 2 }
   0xa   : > { %227 = sbr.rel (%p2557_p6) target bundleno = 24 (0x18), region = 40 }
  0x11   : > { %230 = sbr.rel (!%p33_p4) target bundleno = 24 (0x18), region = 44  ;;  %s232_s10 = sand.u32 (%p33_p4), 1, %s2834_s25  }
  0x12   : > { %s2648_s11 = sshll.u32 (%p33_p4), %s2838_s26, 4  ;;  %s2558_s12 = sshll.u32 (%p33_p4), %s232_s10, 5 }
  0x13   : > { %s237_s15 = scalar_lea.vmem (%p33_p4), %s3620_s0, %s2648_s11  ;;  %s234_s16 = scalar_lea.vmem (%p33_p4), [#allocation2], %s2558_s12 }
  0x14   : > { %v250_v0 = vld [vmem:[%s237_s15] sm:$0xff] (%p33_p4)  ;;  %v252_v1 = vld [vmem:[%s237_s15 + $0x8] sm:$0xff] (%p33_p4) }
  0x15   : > { %v254_v2 = vld [vmem:[%s237_s15 + $0x20] sm:$0xff] (%p33_p4)  ;;  %251 = vst [vmem:[%s234_s16] sm:$0xff] (%p33_p4), %v250_v0  ;;  %253 = vst [vmem:[%s234_s16 + $0x8] sm:$0xff] (%p33_p4), %v252_v1  ;;  %v256_v3 = vld [vmem:[%s237_s15 + $0x28] sm:$0xff] (%p33_p4) }
  0x16   : > { %255 = vst [vmem:[%s234_s16 + $0x10] sm:$0xff] (%p33_p4), %v254_v2  ;;  %257 = vst [vmem:[%s234_s16 + $0x18] sm:$0xff] (%p33_p4), %v256_v3 }
  0x18 PF: > { %p2561_p7 = scmp.ge.s32.totalorder %s2838_s26, 1  ;;  %p262_p8 = scmp.lt.s32.totalorder %s2838_s26, 3 }
  0x1a   : > { %p263_p9 = pnand %p2561_p7, %p262_p8 }
  0x1b   : > { %s269_s17 = sand.u32 (!%p263_p9), 1, %s2830_s24   ;;  %v306_v4 = vld [vmem:[%s3622_s2] sm:$0xff] (!%p263_p9)  ;;  %v2840_v5 = vmov (!%p263_p9), 0.0   ;;  %v2841_v6 = vmov (!%p263_p9), 0   ;;  %vm312_vm0 = vcmask (!%p263_p9), 130048   ;;  %v2605_v15 = vld [vmem:[%s3624_s4 + $0x18] sm:$0xff] (!%p263_p9) }
  0x1c   : > { %266 = sbr.rel (%p263_p9) target bundleno = 2425 (0x979), region = 67  ;;  %s2934_s20 = sshll.u32 (!%p263_p9), %s269_s17, 5  ;;  %380 = vmatprep.mubr.f32.mxu0 (!%p263_p9), %v2840_v5  ;;  %2742 = vset.pattern.permute.xlu0 (!%p263_p9), %v2841_v6  ;;  %v596_v7 = vld [vmem:[%s3624_s4] sm:$0xff] (!%p263_p9)  ;;  %v2627_v16 = vld [vmem:[%s3624_s4 + $0x28] sm:$0xff] (!%p263_p9)  ;;  %v2842_v44 = vmov (!%p263_p9), 2102212464  }
  0x1d   : > { %309 = vperm.xlu0 (!%p263_p9), %2742, %v306_v4   ;;  %670 = vmatprep.mubr.f32.mxu1 (!%p263_p9), %v2840_v5  ;;  %s271_s23 = scalar_lea.vmem (!%p263_p9), [#allocation2], %s2934_s20  ;;  %v305_v14 = vld [vmem:[%s3621_s1] sm:$0xff] (!%p263_p9)  ;;  %v2343_v17 = vld [vmem:[%s3626_s6 + $0x8] sm:$0xff] (!%p263_p9)  ;;  %v2843_v46 = vmov (!%p263_p9), 920167782   ;;  %s298_s24 = scalar_lea.vmem (!%p263_p9), [#allocation3], %s2934_s20 }
  0x1e   : > { %v302_v8 = vld [vmem:[%s271_s23 + $0x8] sm:$0xff] (!%p263_p9)  ;;  %v304_v9 = vld [vmem:[%s271_s23 + $0x18] sm:$0xff] (!%p263_p9)  ;;  %v301_v10 = vld [vmem:[%s271_s23] sm:$0xff] (!%p263_p9)  ;;  %2743 = vset.pattern.permute.xlu1 (!%p263_p9), %v2841_v6  ;;  %v2844_v51 = vmov (!%p263_p9), 1326507024  }
  0x1f   : > { %v2650_v11 = vpack.c.bf16 (!%p263_p9), %v304_v9, %v302_v8  ;;  %v303_v12 = vld [vmem:[%s271_s23 + $0x10] sm:$0xff] (!%p263_p9)  ;;  %v2845_v57 = vmov (!%p263_p9), 683565275   ;;  %v2846_v59 = vmov (!%p263_p9), 2475754826  }
  0x20   : > { %v2652_v13 = vpack.c.bf16 (!%p263_p9), %v303_v12, %v301_v10  ;;  %v2847_v62 = vmov (!%p263_p9), 2131351028  }
  0x21   : > { %2651 = vmatprep.subr.bf16.mxu0 (!%p263_p9), %v2650_v11  ;;  %599 = vperm.xlu0 (!%p263_p9), %2742, %v596_v7  }
  0x22   : > { %2653 = vmatpush1.bf16.msra.mxu0 (!%p263_p9), %v2652_v13 }
  0x23   : > { %s2649_s29 = sshll.u32 (%p2918_p5), %s2554_s27, 4 }
  0x24   : > { %s2474_s11 = scalar_lea.vmem (%p2918_p5), %s3627_s7, %s2649_s29 }
  0x25   : > { %2564 = vmatmul.mubr.msk.f32.vlgmr.msra.gmra.mrb[0].mxu0 %vm312_vm0, %v305_v14  ;;  %1473 = vperm.xlu0 %2742, %v2605_v15  }
  0x26   : > { %1834 = vmatprep.mubr.f32.mxu0 %v2840_v5 }
  0x29   : > { %2055 = vperm.xlu0 %2742, %v2627_v16  }
  0x2d   : > { %2351 = vperm.xlu0 %2742, %v2343_v17  }
  0x9c   : > { %v310_v18 = vpop.permute.xlu0 %309 }
  0xf8   : > { %v382_v19 = vpop.f32.mrb[0].mxu0 }
  0xf9   : > { %v2955_v20 = vadd.f32 %v382_v19, %v310_v18  ;;  %v384_v21 = vpop.f32.mrb[1].mxu0 }
  0xfa   : > { %v2957_v22 = vadd.f32 %v384_v21, %v310_v18 }
  0xfb   : > { %v390_v23 = vand.u32 2139095040, %v2955_v20  ;;  %v387_v29 = vand.u32 2147483647, %v2955_v20 }
  0xfc   : > { %v494_v24 = vand.u32 2139095040, %v2957_v22  ;;  %v491_v25 = vand.u32 2147483647, %v2957_v22  ;;  %vm493_vm15 = vcmp.lt.s32.totalorder %v2957_v22, 0 }
  0xfd   : > { %v391_v26 = vshrl.u32 %v390_v23, 23  ;;  %v2967_v34 = vand.u32 8388607, %v387_v29 }
  0xfe   : > { %v495_v27 = vshrl.u32 %v494_v24, 23  ;;  %v498_v31 = vand.u32 8388607, %v491_v25  ;;  %vm492_vm0 = vcmp.le.f32.partialorder %v491_v25, 0.7853982 }
  0xff   : > { %v2565_v28 = vadd.s32 4294967169, %v391_v26  ;;  %v395_v43 = vor.u32 8388608, %v2967_v34 }
 0x100   : > { %v2569_v30 = vadd.s32 4294967169, %v495_v27  ;;  %v499_v36 = vor.u32 8388608, %v498_v31 }
 0x101   : > { %v397_v32 = vadd.s32 1, %v2565_v28 }
 0x102   : > { %v501_v33 = vadd.s32 1, %v2569_v30  ;;  %v2981_v49 = vshll.u32 %v499_v36, 8 }
 0x103   : > { %vm398_vm1 = vcmp.gt.s32.totalorder %v397_v32, 0 }
 0x104   : > { %v399_v35 = vsel %vm398_vm1, %v397_v32, 0  ;;  %vm502_vm2 = vcmp.gt.s32.totalorder %v501_v33, 0  ;;  %vm389_vm1 = vcmp.lt.s32.totalorder %v2955_v20, 0 }
 0x105   : > { %v2969_v37 = vand.u32 31, %v399_v35  ;;  %v503_v38 = vsel %vm502_vm2, %v501_v33, 0  ;;  %v2971_v39 = vshrl.u32 %v399_v35, 5  ;;  %vm388_vm2 = vcmp.le.f32.partialorder %v387_v29, 0.7853982 }
 0x106   : > { %v505_v40 = vand.u32 31, %v503_v38  ;;  %v504_v42 = vshrl.u32 %v503_v38, 5 }
 0x107   : > { %v2974_v41 = vsub.s32 32, %v2969_v37  ;;  %v413_v45 = vshll.u32 %v2842_v44, %v2969_v37  ;;  %v416_v47 = vshll.u32 %v2843_v46, %v2969_v37  ;;  %vm422_vm3 = vcmp.lt.s32.totalorder %v2971_v39, 4 }
 0x108   : > { %v506_v48 = vsub.s32 32, %v505_v40  ;;  %v517_v53 = vshll.u32 %v2842_v44, %v505_v40  ;;  %v520_v54 = vshll.u32 %v2843_v46, %v505_v40  ;;  %v508_v58 = vshll.u32 %v2845_v57, %v505_v40 }
 0x109   : > { %v414_v50 = vshrl.u32 %v2843_v46, %v2974_v41  ;;  %v417_v52 = vshrl.u32 %v2844_v51, %v2974_v41  ;;  %vm526_vm4 = vcmp.lt.s32.totalorder %v504_v42, 4  ;;  %v511_v61 = vshll.u32 %v2846_v59, %v505_v40 }
 0x10a   : > { %v518_v55 = vshrl.u32 %v2843_v46, %v506_v48  ;;  %v521_v56 = vshrl.u32 %v2844_v51, %v506_v48  ;;  %v509_v60 = vshrl.u32 %v2846_v59, %v506_v48  ;;  %v512_v63 = vshrl.u32 %v2847_v62, %v506_v48 }
 0x10b   : > { %v514_v0 = vshll.u32 %v2847_v62, %v505_v40  ;;  %v515_v4 = vshrl.u32 %v2842_v44, %v506_v48  ;;  %v415_v6 = vor.u32 %v414_v50, %v413_v45  ;;  %v418_v7 = vor.u32 %v417_v52, %v416_v47 }
 0x10c   : > { %v519_v1 = vor.u32 %v518_v55, %v517_v53  ;;  %v522_v2 = vor.u32 %v521_v56, %v520_v54  ;;  %v510_v3 = vor.u32 %v509_v60, %v508_v58  ;;  %v507_v8 = vshrl.u32 %v2845_v57, %v506_v48 }
 0x10d   : > { %v513_v9 = vor.u32 %v512_v63, %v511_v61  ;;  %v516_v12 = vor.u32 %v515_v4, %v514_v0  ;;  %vm523_vm5 = vcmp.lt.s32.totalorder %v504_v42, 1  ;;  %vm524_vm6 = vcmp.lt.s32.totalorder %v504_v42, 2 }
 0x10e   : > { %v532_v10 = vsel %vm526_vm4, %v519_v1, 920167782  ;;  %v536_v11 = vsel %vm526_vm4, %v522_v2, 1326507024  ;;  %vm525_vm7 = vcmp.lt.s32.totalorder %v504_v42, 3  ;;  %v527_v13 = vsel %vm523_vm5, %v507_v8, %v510_v3 }
 0x10f   : > { %v531_v14 = vsel %vm523_vm5, %v510_v3, %v513_v9  ;;  %v528_v15 = vsel %vm526_vm4, %v516_v12, 2102212464  ;;  %v533_v16 = vsel %vm525_vm7, %v516_v12, %v532_v10  ;;  %v535_v17 = vsel %vm523_vm5, %v513_v9, %v516_v12 }
 0x110   : > { %v537_v18 = vsel %vm525_vm7, %v519_v1, %v536_v11  ;;  %v529_v19 = vsel %vm525_vm7, %v513_v9, %v528_v15  ;;  %v534_v21 = vsel %vm524_vm6, %v531_v14, %v533_v16  ;;  %v404_v24 = vshll.u32 %v2845_v57, %v2969_v37 }
 0x111   : > { %v538_v23 = vsel %vm524_vm6, %v535_v17, %v537_v18  ;;  %v530_v26 = vsel %vm524_vm6, %v527_v13, %v529_v19  ;;  %v405_v30 = vshrl.u32 %v2846_v59, %v2974_v41  ;;  %v432_v31 = vsel %vm422_vm3, %v418_v7, 1326507024 }
 0x112   : > { %v3005_v27 = vmul.u32.u64.low %v2981_v49, %v538_v23  ;;  %v3006_v28 = vmul.u32.u64.high %v2981_v49, %v538_v23, %v3005_v27  ;;  %v3013_v32 = vmul.u32.u64.low %v2981_v49, %v534_v21  ;;  %v3014_v33 = vmul.u32.u64.high %v2981_v49, %v534_v21, %v3013_v32 }
 0x113   : > { %v407_v35 = vshll.u32 %v2846_v59, %v2969_v37  ;;  %v406_v36 = vor.u32 %v405_v30, %v404_v24  ;;  %v408_v38 = vshrl.u32 %v2847_v62, %v2974_v41  ;;  %v410_v40 = vshll.u32 %v2847_v62, %v2969_v37 }
 0x114   : > { %v411_v42 = vshrl.u32 %v2842_v44, %v2974_v41  ;;  %v428_v45 = vsel %vm422_vm3, %v415_v6, 920167782  ;;  %v546_v47 = vmul.u32 %v2981_v49, %v530_v26  ;;  %v403_v48 = vshrl.u32 %v2845_v57, %v2974_v41 }
 0x115   : > { %v435_v50 = vshll.u32 %v395_v43, 8  ;;  %vm548_vm8 = vc.u32 %v3006_v28, %v3013_v32  ;;  %v409_v52 = vor.u32 %v408_v38, %v407_v35  ;;  %vm421_vm9 = vcmp.lt.s32.totalorder %v2971_v39, 3 }
 0x116   : > { %v412_v53 = vor.u32 %v411_v42, %v410_v40  ;;  %v549_v37 = vadd.s32 1, %v3014_v33  ;;  %vm419_vm10 = vcmp.lt.s32.totalorder %v2971_v39, 1  ;;  %vm420_vm11 = vcmp.lt.s32.totalorder %v2971_v39, 2 }
 0x117   : > { %v433_v54 = vsel %vm421_vm9, %v415_v6, %v432_v31  ;;  %v427_v41 = vsel %vm419_vm10, %v406_v36, %v409_v52  ;;  %v423_v56 = vsel %vm419_vm10, %v403_v48, %v406_v36  ;;  %v547_v26 = vadd.s32 %v3013_v32, %v3006_v28 }
 0x118   : > { %v424_v49 = vsel %vm422_vm3, %v412_v53, 2102212464  ;;  %v429_v55 = vsel %vm421_vm9, %v412_v53, %v428_v45  ;;  %v431_v34 = vsel %vm419_vm10, %v409_v52, %v412_v53  ;;  %v550_v43 = vsel %vm548_vm8, %v549_v37, %v3014_v33 }
 0x119   : > { %v430_v58 = vsel %vm420_vm11, %v427_v41, %v429_v55  ;;  %v434_v60 = vsel %vm420_vm11, %v431_v34, %v433_v54  ;;  %v551_v61 = vadd.s32 %v550_v43, %v546_v47  ;;  %v425_v63 = vsel %vm421_vm9, %v409_v52, %v424_v49 }
 0x11a   : > { %v3043_v0 = vmul.u32.u64.low %v435_v50, %v434_v60  ;;  %v3044_v1 = vmul.u32.u64.high %v435_v50, %v434_v60, %v3043_v0  ;;  %v3046_v2 = vmul.u32.u64.low %v435_v50, %v430_v58  ;;  %v3047_v3 = vmul.u32.u64.high %v435_v50, %v430_v58, %v3046_v2 }
 0x11b   : > { %v552_v4 = vadd.s32 536870912, %v551_v61  ;;  %v426_v6 = vsel %vm420_vm11, %v423_v56, %v425_v63  ;;  %vm583_vm6 = vweird.f32 %v2957_v22  ;;  %vm479_vm10 = vweird.f32 %v2955_v20 }
 0x11c   : > { %vm444_vm12 = vc.u32 %v3044_v1, %v3046_v2  ;;  %v445_v8 = vadd.s32 1, %v3047_v3  ;;  %v442_v10 = vmul.u32 %v435_v50, %v426_v6  ;;  %v443_v53 = vadd.s32 %v3046_v2, %v3044_v1 }
 0x11d   : > { %v553_v7 = vshrl.u32 %v552_v4, 30  ;;  %vm602_vm11 = vcmask 64512  }
 0x11e   : > { %v446_v11 = vsel %vm444_vm12, %v445_v8, %v3047_v3 }
 0x11f   : > { %v554_v9 = vshll.u32 %v553_v7, 30  ;;  %v447_v13 = vadd.s32 %v446_v11, %v442_v10  ;;  %v577_v32 = vsub.s32 4, %v553_v7 }
 0x121   : > { %v555_v12 = vsub.s32 %v551_v61, %v554_v9  ;;  %v448_v15 = vadd.s32 536870912, %v447_v13  ;;  %v578_v60 = vsel %vm493_vm15, %v577_v32, %v553_v7 }
 0x122   : > { %v580_v0 = vsel %vm492_vm0, 0, %v578_v60 }
 0x123   : > { %v557_v14 = vsub.s32 0, %v555_v12  ;;  %v449_v17 = vshrl.u32 %v448_v15, 30  ;;  %v584_v6 = vadd.s32 3, %v580_v0 }
 0x125   : > { %v2570_v16 = vmin.u32 %v557_v14, %v555_v12  ;;  %v450_v19 = vshll.u32 %v449_v17, 30  ;;  %v473_v4 = vsub.s32 4, %v449_v17  ;;  %v585_v7 = vand.u32 3, %v584_v6 }
 0x127   : > { %v559_v18 = vclz %v2570_v16  ;;  %v451_v39 = vsub.s32 %v447_v13, %v450_v19  ;;  %v474_v9 = vsel %vm389_vm1, %v473_v4, %v449_v17  ;;  %vm590_vm3 = vcmp.eq.s32.totalorder %v585_v7, 2 }
 0x128   : > { %vm587_vm4 = vcmp.eq.s32.totalorder %v585_v7, 0  ;;  %vm586_vm5 = vcmp.lt.s32.totalorder %v585_v7, 2 }
 0x129   : > { %v2571_v21 = vadd.s32 4294967294, %v559_v18  ;;  %v453_v24 = vsub.s32 0, %v451_v39 }
 0x12b   : > { %vm2572_vm13 = vcmp.lt.s32.totalorder %v2571_v21, 0  ;;  %v2566_v31 = vmin.u32 %v453_v24, %v451_v39 }
 0x12c   : > { %v562_v23 = vsel %vm2572_vm13, 0, %v2571_v21 }
 0x12d   : > { %v563_v27 = vsub.s32 32, %v562_v23  ;;  %v567_v30 = vsub.s32 4294967266, %v562_v23  ;;  %v564_v33 = vshll.u32 %v555_v12, %v562_v23  ;;  %v455_v38 = vclz %v2566_v31 }
 0x12e   : > { %v476_v12 = vsel %vm388_vm2, 0, %v474_v9 }
 0x12f   : > { %v565_v35 = vshrl.u32 %v547_v26, %v563_v27  ;;  %v568_v36 = vadd.s32 127, %v567_v30  ;;  %v2567_v45 = vadd.s32 4294967294, %v455_v38  ;;  %v480_v18 = vadd.s32 3, %v476_v12  ;;  %v2342_v38 = vld [vmem:[%s3626_s6] sm:$0xff] }
 0x131   : > { %v566_v40 = vor.u32 %v565_v35, %v564_v33  ;;  %v569_v42 = vshll.u32 %v568_v36, 23  ;;  %vm2568_vm14 = vcmp.lt.s32.totalorder %v2567_v45, 0  ;;  %v481_v21 = vand.u32 3, %v480_v18  ;;  %v2583_v35 = vld [vmem:[%s3624_s4 + $0x8] sm:$0xff]  ;;  %v2616_v36 = vld [vmem:[%s3624_s4 + $0x20] sm:$0xff] }
 0x132   : > { %v458_v52 = vsel %vm2568_vm14, 0, %v2567_v45  ;;  %891 = vperm.xlu1 %2743, %v2583_v35  }
 0x133   : > { %v570_v47 = vor.u32 4788187, %v569_v42  ;;  %v573_v50 = vcvt.s32.f32 %v566_v40  ;;  %v459_v37 = vsub.s32 32, %v458_v52  ;;  %v463_v54 = vsub.s32 4294967266, %v458_v52  ;;  %v600_v40 = vpop.permute.xlu0 %599 }
 0x134   : > { %v460_v49 = vshll.u32 %v451_v39, %v458_v52  ;;  %vm486_vm7 = vcmp.eq.s32.totalorder %v481_v21, 2  ;;  %vm483_vm8 = vcmp.eq.s32.totalorder %v481_v21, 0  ;;  %vm482_vm9 = vcmp.lt.s32.totalorder %v481_v21, 2 }
 0x135   : > { %v571_v48 = vand.u32 2147483647, %v570_v47  ;;  %v461_v41 = vshrl.u32 %v443_v53, %v459_v37  ;;  %v464_v55 = vadd.s32 127, %v463_v54 }
 0x137   : > { %v574_v28 = vmul.f32 %v573_v50, %v571_v48  ;;  %v462_v43 = vor.u32 %v461_v41, %v460_v49  ;;  %v465_v56 = vshll.u32 %v464_v55, 23 }
 0x139   : > { %v575_v34 = vxor.u32 2147483648, %v574_v28  ;;  %v466_v63 = vor.u32 4788187, %v465_v56  ;;  %v469_v2 = vcvt.s32.f32 %v462_v43 }
 0x13b   : > { %v576_v58 = vsel %vm493_vm15, %v575_v34, %v574_v28  ;;  %v467_v1 = vand.u32 2147483647, %v466_v63 }
 0x13c   : > { %v579_v61 = vsel %vm492_vm0, %v2957_v22, %v576_v58  ;;  %v595_v22 = vld [vmem:[%s3623_s3] sm:$0xff] }
 0x13d   : > { %2744 = vcosq.f32 %v579_v61  ;;  %v470_v3 = vmul.f32 %v469_v2, %v467_v1 }
 0x13e   : > { %2746 = vsinq.f32 %v579_v61 }
 0x13f   : > { %v471_v8 = vxor.u32 2147483648, %v470_v3 }
 0x141   : > { %v472_v25 = vsel %vm389_vm1, %v471_v8, %v470_v3 }
 0x142   : > { %v475_v10 = vsel %vm388_vm2, %v2955_v20, %v472_v25  ;;  %v2594_v20 = vld [vmem:[%s3624_s4 + $0x10] sm:$0xff] }
 0x143   : > { %2748 = vcosq.f32 %v475_v10  ;;  %1182 = vperm.xlu1 %2743, %v2594_v20  }
 0x144   : > { %2750 = vsinq.f32 %v475_v10 }
 0x147   : > { %v2745_v11 = vpop.eup %2744  ;;  %1764 = vperm.xlu1 %2743, %v2616_v36  }
 0x148   : > { %v2747_v13 = vpop.eup %2746  ;;  %v591_v14 = vxor.u32 2147483648, %v2745_v11 }
 0x149   : > { %v588_v15 = vxor.u32 2147483648, %v2747_v13 }
 0x14a   : > { %v592_v16 = vsel %vm590_vm3, %v591_v14, %v2747_v13 }
 0x14b   : > { %v589_v19 = vsel %vm587_vm4, %v2745_v11, %v588_v15  ;;  %2346 = vperm.xlu1 %2743, %v2342_v38  }
 0x14c   : > { %v593_v29 = vsel %vm586_vm5, %v589_v19, %v592_v16 }
 0x14d   : > { %v594_v17 = vsel %vm583_vm6, nan, %v593_v29  ;;  %v2749_v39 = vpop.eup %2748 }
 0x14e   : > { %606 = vmatprep.subr.mxu1 %v594_v17  ;;  %v2751_v23 = vpop.eup %2750  ;;  %v487_v24 = vxor.u32 2147483648, %v2749_v39 }
 0x14f   : > { %v484_v26 = vxor.u32 2147483648, %v2751_v23 }
 0x150   : > { %v488_v27 = vsel %vm486_vm7, %v487_v24, %v2751_v23 }
 0x151   : > { %v485_v30 = vsel %vm483_vm8, %v2749_v39, %v484_v26 }
 0x152   : > { %v489_v31 = vsel %vm482_vm9, %v485_v30, %v488_v27 }
 0x153   : > { %v490_v33 = vsel %vm479_vm10, nan, %v489_v31 }
 0x154   : > { %607 = vmatpush1.msra.mxu1 %v490_v33 }
 0x155   : > { %2573 = vmatmul.mubr.msk.f32.vlgmr.msra.gmra.mrb[0].mxu1 %vm602_vm11, %v595_v22 }
 0x156   : > { %961 = vmatprep.mubr.f32.mxu1 %v2840_v5 }
 0x228   : > { %v672_v42 = vpop.f32.mrb[0].mxu1 }
 0x229   : > { %v3083_v45 = vadd.f32 %v672_v42, %v600_v40  ;;  %v674_v47 = vpop.f32.mrb[1].mxu1 }
 0x22a   : > { %v3085_v48 = vadd.f32 %v674_v47, %v600_v40 }
 0x22b   : > { %v677_v50 = vand.u32 2147483647, %v3083_v45  ;;  %v680_v52 = vand.u32 2139095040, %v3083_v45  ;;  %vm679_vm10 = vcmp.lt.s32.totalorder %v3083_v45, 0 }
 0x22c   : > { %v784_v53 = vand.u32 2139095040, %v3085_v48  ;;  %v781_v28 = vand.u32 2147483647, %v3085_v48 }
 0x22d   : > { %v681_v37 = vshrl.u32 %v680_v52, 23  ;;  %v684_v54 = vand.u32 8388607, %v677_v50 }
 0x22e   : > { %v785_v32 = vshrl.u32 %v784_v53, 23  ;;  %v788_v43 = vand.u32 8388607, %v781_v28 }
 0x22f   : > { %v2574_v49 = vadd.s32 4294967169, %v681_v37  ;;  %v685_v34 = vor.u32 8388608, %v684_v54 }
 0x230   : > { %v2578_v41 = vadd.s32 4294967169, %v785_v32  ;;  %v789_v1 = vor.u32 8388608, %v788_v43 }
 0x231   : > { %v687_v55 = vadd.s32 1, %v2574_v49  ;;  %v3095_v0 = vshll.u32 %v685_v34, 8 }
 0x232   : > { %v791_v56 = vadd.s32 1, %v2578_v41 }
 0x233   : > { %vm688_vm12 = vcmp.gt.s32.totalorder %v687_v55, 0 }
 0x234   : > { %v689_v58 = vsel %vm688_vm12, %v687_v55, 0  ;;  %vm792_vm13 = vcmp.gt.s32.totalorder %v791_v56, 0  ;;  %vm678_vm12 = vcmp.le.f32.partialorder %v677_v50, 0.7853982 }
 0x235   : > { %v690_v60 = vshrl.u32 %v689_v58, 5  ;;  %v691_v61 = vand.u32 31, %v689_v58  ;;  %v793_v63 = vsel %vm792_vm13, %v791_v56, 0  ;;  %v829_v58 = vshll.u32 %v789_v1, 8 }
 0x236   : > { %v3098_v4 = vshrl.u32 %v793_v63, 5  ;;  %v795_v6 = vand.u32 31, %v793_v63  ;;  %vm783_vm13 = vcmp.lt.s32.totalorder %v3085_v48, 0 }
 0x237   : > { %v692_v2 = vsub.s32 32, %v691_v61  ;;  %v694_v3 = vshll.u32 %v2845_v57, %v691_v61  ;;  %v697_v8 = vshll.u32 %v2846_v59, %v691_v61  ;;  %v700_v25 = vshll.u32 %v2847_v62, %v691_v61 }
 0x238   : > { %v703_v9 = vshll.u32 %v2842_v44, %v691_v61  ;;  %v706_v7 = vshll.u32 %v2843_v46, %v691_v61  ;;  %vm709_vm14 = vcmp.lt.s32.totalorder %v690_v60, 1  ;;  %vm710_vm15 = vcmp.lt.s32.totalorder %v690_v60, 2 }
 0x239   : > { %v695_v10 = vshrl.u32 %v2846_v59, %v692_v2  ;;  %v698_v11 = vshrl.u32 %v2847_v62, %v692_v2  ;;  %v701_v12 = vshrl.u32 %v2842_v44, %v692_v2  ;;  %v693_v13 = vshrl.u32 %v2845_v57, %v692_v2 }
 0x23a   : > { %v704_v14 = vshrl.u32 %v2843_v46, %v692_v2  ;;  %v707_v15 = vshrl.u32 %v2844_v51, %v692_v2  ;;  %v796_v29 = vsub.s32 32, %v795_v6  ;;  %vm711_vm0 = vcmp.lt.s32.totalorder %v690_v60, 3 }
 0x23b   : > { %v696_v16 = vor.u32 %v695_v10, %v694_v3  ;;  %v699_v18 = vor.u32 %v698_v11, %v697_v8  ;;  %v702_v19 = vor.u32 %v701_v12, %v700_v25  ;;  %vm712_vm1 = vcmp.lt.s32.totalorder %v690_v60, 4 }
 0x23c   : > { %v705_v17 = vor.u32 %v704_v14, %v703_v9  ;;  %v708_v21 = vor.u32 %v707_v15, %v706_v7  ;;  %v798_v22 = vshll.u32 %v2845_v57, %v795_v6  ;;  %v799_v20 = vshrl.u32 %v2846_v59, %v796_v29 }
 0x23d   : > { %v713_v39 = vsel %vm709_vm14, %v693_v13, %v696_v16  ;;  %v714_v23 = vsel %vm712_vm1, %v702_v19, 2102212464  ;;  %v717_v24 = vsel %vm709_vm14, %v696_v16, %v699_v18  ;;  %v721_v26 = vsel %vm709_vm14, %v699_v18, %v702_v19 }
 0x23e   : > { %v715_v27 = vsel %vm711_vm0, %v699_v18, %v714_v23  ;;  %v718_v30 = vsel %vm712_vm1, %v705_v17, 920167782  ;;  %v722_v31 = vsel %vm712_vm1, %v708_v21, 1326507024  ;;  %v801_v36 = vshll.u32 %v2846_v59, %v795_v6 }
 0x23f   : > { %v719_v33 = vsel %vm711_vm0, %v702_v19, %v718_v30  ;;  %v723_v35 = vsel %vm711_vm0, %v705_v17, %v722_v31  ;;  %v716_v38 = vsel %vm710_vm15, %v713_v39, %v715_v27  ;;  %v802_v47 = vshrl.u32 %v2847_v62, %v796_v29 }
 0x240   : > { %v720_v40 = vsel %vm710_vm15, %v717_v24, %v719_v33  ;;  %v724_v42 = vsel %vm710_vm15, %v721_v26, %v723_v35  ;;  %v800_v32 = vor.u32 %v799_v20, %v798_v22  ;;  %v804_v41 = vshll.u32 %v2847_v62, %v795_v6 }
 0x241   : > { %v3121_v52 = vmul.u32.u64.low %v3095_v0, %v724_v42  ;;  %v3122_v53 = vmul.u32.u64.high %v3095_v0, %v724_v42, %v3121_v52  ;;  %v3125_v37 = vmul.u32.u64.low %v3095_v0, %v720_v40  ;;  %v3126_v54 = vmul.u32.u64.high %v3095_v0, %v720_v40, %v3125_v37 }
 0x242   : > { %v803_v49 = vor.u32 %v802_v47, %v801_v36  ;;  %v805_v55 = vshrl.u32 %v2842_v44, %v796_v29  ;;  %v807_v34 = vshll.u32 %v2842_v44, %v795_v6  ;;  %v808_v43 = vshrl.u32 %v2843_v46, %v796_v29 }
 0x243   : > { %v811_v56 = vshrl.u32 %v2844_v51, %v796_v29  ;;  %v732_v60 = vmul.u32 %v3095_v0, %v716_v38  ;;  %v797_v61 = vshrl.u32 %v2845_v57, %v796_v29  ;;  %v810_v2 = vshll.u32 %v2843_v46, %v795_v6 }
 0x244   : > { %v806_v63 = vor.u32 %v805_v55, %v804_v41  ;;  %vm734_vm2 = vc.u32 %v3122_v53, %v3125_v37  ;;  %v735_v3 = vadd.s32 1, %v3126_v54  ;;  %v809_v8 = vor.u32 %v808_v43, %v807_v34 }
 0x245   : > { %vm813_vm3 = vcmp.lt.s32.totalorder %v3098_v4, 1  ;;  %v812_v25 = vor.u32 %v811_v56, %v810_v2  ;;  %vm815_vm4 = vcmp.lt.s32.totalorder %v3098_v4, 3  ;;  %vm816_vm5 = vcmp.lt.s32.totalorder %v3098_v4, 4 }
 0x246   : > { %v821_v1 = vsel %vm813_vm3, %v800_v32, %v803_v49  ;;  %v736_v0 = vsel %vm734_vm2, %v735_v3, %v3126_v54  ;;  %v818_v9 = vsel %vm816_vm5, %v806_v63, 2102212464  ;;  %v822_v7 = vsel %vm816_vm5, %v809_v8, 920167782 }
 0x247   : > { %v825_v10 = vsel %vm813_vm3, %v803_v49, %v806_v63  ;;  %v737_v11 = vadd.s32 %v736_v0, %v732_v60  ;;  %vm814_vm6 = vcmp.lt.s32.totalorder %v3098_v4, 2  ;;  %v823_v6 = vsel %vm815_vm4, %v806_v63, %v822_v7 }
 0x248   : > { %v826_v12 = vsel %vm816_vm5, %v812_v25, 1326507024  ;;  %v817_v13 = vsel %vm813_vm3, %v797_v61, %v800_v32  ;;  %v819_v14 = vsel %vm815_vm4, %v803_v49, %v818_v9  ;;  %v824_v15 = vsel %vm814_vm6, %v821_v1, %v823_v6 }
 0x249   : > { %v827_v16 = vsel %vm815_vm4, %v809_v8, %v826_v12  ;;  %v738_v18 = vadd.s32 536870912, %v737_v11  ;;  %v3143_v29 = vmul.u32.u64.low %v829_v58, %v824_v15  ;;  %v3144_v17 = vmul.u32.u64.high %v829_v58, %v824_v15, %v3143_v29 }
 0x24a   : > { %v828_v19 = vsel %vm814_vm6, %v825_v10, %v827_v16  ;;  %v820_v24 = vsel %vm814_vm6, %v817_v13, %v819_v14  ;;  %v733_v32 = vadd.s32 %v3125_v37, %v3122_v53  ;;  %vm782_vm14 = vcmp.le.f32.partialorder %v781_v28, 0.7853982 }
 0x24b   : > { %v3146_v21 = vmul.u32.u64.low %v829_v58, %v828_v19  ;;  %v3147_v39 = vmul.u32.u64.high %v829_v58, %v828_v19, %v3146_v21  ;;  %v739_v23 = vshrl.u32 %v738_v18, 30  ;;  %v839_v27 = vadd.s32 1, %v3144_v17 }
 0x24c   : > { %v836_v4 = vmul.u32 %v829_v58, %v820_v24  ;;  %vm769_vm2 = vweird.f32 %v3083_v45  ;;  %vm873_vm6 = vweird.f32 %v3085_v48 }
 0x24d   : > { %v740_v26 = vshll.u32 %v739_v23, 30  ;;  %vm838_vm7 = vc.u32 %v3147_v39, %v3143_v29  ;;  %v837_v1 = vadd.s32 %v3143_v29, %v3147_v39  ;;  %v763_v37 = vsub.s32 4, %v739_v23 }
 0x24e   : > { %v840_v31 = vsel %vm838_vm7, %v839_v27, %v3144_v17 }
 0x24f   : > { %v741_v30 = vsub.s32 %v737_v11, %v740_v26  ;;  %v841_v22 = vadd.s32 %v840_v31, %v836_v4  ;;  %v764_v15 = vsel %vm679_vm10, %v763_v37, %v739_v23 }
 0x250   : > { %v766_v17 = vsel %vm678_vm12, 0, %v764_v15 }
 0x251   : > { %v743_v33 = vsub.s32 0, %v741_v30  ;;  %v842_v35 = vadd.s32 536870912, %v841_v22  ;;  %v770_v24 = vadd.s32 3, %v766_v17 }
 0x253   : > { %v2575_v20 = vmin.u32 %v743_v33, %v741_v30  ;;  %v843_v36 = vshrl.u32 %v842_v35, 30  ;;  %v771_v4 = vand.u32 3, %v770_v24 }
 0x255   : > { %v745_v38 = vclz %v2575_v20  ;;  %v844_v40 = vshll.u32 %v843_v36, 30  ;;  %v867_v39 = vsub.s32 4, %v843_v36  ;;  %vm776_vm15 = vcmp.eq.s32.totalorder %v771_v4, 2 }
 0x256   : > { %vm773_vm0 = vcmp.eq.s32.totalorder %v771_v4, 0  ;;  %vm772_vm1 = vcmp.lt.s32.totalorder %v771_v4, 2 }
 0x257   : > { %v2576_v42 = vadd.s32 4294967294, %v745_v38  ;;  %v845_v47 = vsub.s32 %v841_v22, %v844_v40  ;;  %v868_v50 = vsel %vm783_vm13, %v867_v39, %v843_v36 }
 0x258   : > { %v870_v31 = vsel %vm782_vm14, 0, %v868_v50 }
 0x259   : > { %vm2577_vm8 = vcmp.lt.s32.totalorder %v2576_v42, 0  ;;  %v847_v54 = vsub.s32 0, %v845_v47  ;;  %v874_v20 = vadd.s32 3, %v870_v31 }
 0x25a   : > { %v748_v52 = vsel %vm2577_vm8, 0, %v2576_v42 }
 0x25b   : > { %v749_v49 = vsub.s32 32, %v748_v52  ;;  %v753_v41 = vsub.s32 4294967266, %v748_v52  ;;  %v2579_v55 = vmin.u32 %v847_v54, %v845_v47  ;;  %v750_v34 = vshll.u32 %v741_v30, %v748_v52 }
 0x25c   : > { %v875_v42 = vand.u32 3, %v874_v20 }
 0x25d   : > { %v751_v43 = vshrl.u32 %v733_v32, %v749_v49  ;;  %v754_v56 = vadd.s32 127, %v753_v41  ;;  %v849_v58 = vclz %v2579_v55 }
 0x25e   : > { %vm880_vm3 = vcmp.eq.s32.totalorder %v875_v42, 2  ;;  %vm877_vm4 = vcmp.eq.s32.totalorder %v875_v42, 0  ;;  %vm876_vm5 = vcmp.lt.s32.totalorder %v875_v42, 2 }
 0x25f   : > { %v752_v60 = vor.u32 %v751_v43, %v750_v34  ;;  %v755_v61 = vshll.u32 %v754_v56, 23  ;;  %v2580_v63 = vadd.s32 4294967294, %v849_v58  ;;  %v892_v43 = vpop.permute.xlu1 %891 }
 0x261   : > { %v756_v2 = vor.u32 4788187, %v755_v61  ;;  %vm2581_vm9 = vcmp.lt.s32.totalorder %v2580_v63, 0  ;;  %v759_v8 = vcvt.s32.f32 %v752_v60 }
 0x262   : > { %v852_v25 = vsel %vm2581_vm9, 0, %v2580_v63 }
 0x263   : > { %v757_v3 = vand.u32 2147483647, %v756_v2  ;;  %v853_v0 = vsub.s32 32, %v852_v25  ;;  %v857_v9 = vsub.s32 4294967266, %v852_v25  ;;  %v854_v7 = vshll.u32 %v845_v47, %v852_v25 }
 0x265   : > { %v760_v53 = vmul.f32 %v759_v8, %v757_v3  ;;  %v855_v10 = vshrl.u32 %v837_v1, %v853_v0  ;;  %v858_v11 = vadd.s32 127, %v857_v9 }
 0x267   : > { %v761_v6 = vxor.u32 2147483648, %v760_v53  ;;  %v856_v12 = vor.u32 %v855_v10, %v854_v7  ;;  %v859_v13 = vshll.u32 %v858_v11, 23 }
 0x269   : > { %v762_v14 = vsel %vm679_vm10, %v761_v6, %v760_v53  ;;  %v860_v18 = vor.u32 4788187, %v859_v13  ;;  %v863_v29 = vcvt.s32.f32 %v856_v12 }
 0x26a   : > { %v765_v16 = vsel %vm678_vm12, %v3083_v45, %v762_v14  ;;  %v2582_v45 = vld [vmem:[%s3623_s3 + $0x8] sm:$0xff] }
 0x26b   : > { %2752 = vcosq.f32 %v765_v16  ;;  %v861_v19 = vand.u32 2147483647, %v860_v18 }
 0x26c   : > { %2754 = vsinq.f32 %v765_v16 }
 0x26d   : > { %v864_v21 = vmul.f32 %v863_v29, %v861_v19 }
 0x26f   : > { %v865_v26 = vxor.u32 2147483648, %v864_v21 }
 0x271   : > { %v866_v27 = vsel %vm783_vm13, %v865_v26, %v864_v21 }
 0x272   : > { %v869_v23 = vsel %vm782_vm14, %v3085_v48, %v866_v27 }
 0x273   : > { %2756 = vcosq.f32 %v869_v23 }
 0x274   : > { %2758 = vsinq.f32 %v869_v23 }
 0x275   : > { %v2753_v30 = vpop.eup %2752 }
 0x276   : > { %v2755_v22 = vpop.eup %2754  ;;  %v777_v33 = vxor.u32 2147483648, %v2753_v30 }
 0x277   : > { %v774_v35 = vxor.u32 2147483648, %v2755_v22 }
 0x278   : > { %v778_v38 = vsel %vm776_vm15, %v777_v33, %v2755_v22 }
 0x279   : > { %v775_v40 = vsel %vm773_vm0, %v2753_v30, %v774_v35 }
 0x27a   : > { %v779_v28 = vsel %vm772_vm1, %v775_v40, %v778_v38 }
 0x27b   : > { %v780_v36 = vsel %vm769_vm2, nan, %v779_v28 }
 0x27d   : > { %v2757_v47 = vpop.eup %2756 }
 0x27e   : > { %v2759_v52 = vpop.eup %2758  ;;  %v881_v54 = vxor.u32 2147483648, %v2757_v47 }
 0x27f   : > { %v878_v32 = vxor.u32 2147483648, %v2759_v52 }
 0x280   : > { %v882_v49 = vsel %vm880_vm3, %v881_v54, %v2759_v52 }
 0x281   : > { %v879_v41 = vsel %vm877_vm4, %v2757_v47, %v878_v32 }
 0x282   : > { %v883_v55 = vsel %vm876_vm5, %v879_v41, %v882_v49 }
 0x283   : > { %v884_v34 = vsel %vm873_vm6, nan, %v883_v55 }
 0x284   : > { %897 = vmatprep.subr.mxu1 %v884_v34 }
 0x285   : > { %898 = vmatpush1.msra.mxu1 %v780_v36 }
 0x286   : > { %2584 = vmatmul.mubr.msk.f32.vlgmr.msra.gmra.mrb[2].mxu1 %vm602_vm11, %v2582_v45 }
 0x287   : > { %1252 = vmatprep.mubr.f32.mxu1 %v2840_v5 }
 0x359   : > { %v963_v56 = vpop.f32.mrb[2].mxu1 }
 0x35a   : > { %v3169_v58 = vadd.f32 %v963_v56, %v892_v43  ;;  %v965_v60 = vpop.f32.mrb[3].mxu1 }
 0x35b   : > { %v3171_v61 = vadd.f32 %v965_v60, %v892_v43 }
 0x35c   : > { %v968_v48 = vand.u32 2147483647, %v3169_v58  ;;  %v971_v63 = vand.u32 2139095040, %v3169_v58  ;;  %vm970_vm6 = vcmp.lt.s32.totalorder %v3169_v58, 0 }
 0x35d   : > { %v1075_v2 = vand.u32 2139095040, %v3171_v61  ;;  %v1072_v25 = vand.u32 2147483647, %v3171_v61 }
 0x35e   : > { %v972_v3 = vshrl.u32 %v971_v63, 23  ;;  %v975_v8 = vand.u32 8388607, %v968_v48 }
 0x35f   : > { %v1076_v1 = vshrl.u32 %v1075_v2, 23  ;;  %v1079_v7 = vand.u32 8388607, %v1072_v25 }
 0x360   : > { %v2585_v0 = vadd.s32 4294967169, %v972_v3  ;;  %v976_v37 = vor.u32 8388608, %v975_v8 }
 0x361   : > { %v2589_v9 = vadd.s32 4294967169, %v1076_v1  ;;  %v1080_v15 = vor.u32 8388608, %v1079_v7 }
 0x362   : > { %v978_v53 = vadd.s32 1, %v2585_v0  ;;  %v3181_v14 = vshll.u32 %v976_v37, 8 }
 0x363   : > { %v1082_v10 = vadd.s32 1, %v2589_v9 }
 0x364   : > { %vm979_vm7 = vcmp.gt.s32.totalorder %v978_v53, 0 }
 0x365   : > { %v980_v11 = vsel %vm979_vm7, %v978_v53, 0  ;;  %vm1083_vm8 = vcmp.gt.s32.totalorder %v1082_v10, 0  ;;  %vm969_vm7 = vcmp.le.f32.partialorder %v968_v48, 0.7853982 }
 0x366   : > { %v981_v6 = vshrl.u32 %v980_v11, 5  ;;  %v982_v12 = vand.u32 31, %v980_v11  ;;  %v1084_v13 = vsel %vm1083_vm8, %v1082_v10, 0  ;;  %v1120_v11 = vshll.u32 %v1080_v15, 8 }
 0x367   : > { %v3184_v19 = vshrl.u32 %v1084_v13, 5  ;;  %v1086_v29 = vand.u32 31, %v1084_v13  ;;  %vm1074_vm8 = vcmp.lt.s32.totalorder %v3171_v61, 0 }
 0x368   : > { %v983_v16 = vsub.s32 32, %v982_v12  ;;  %v985_v18 = vshll.u32 %v2845_v57, %v982_v12  ;;  %v988_v17 = vshll.u32 %v2846_v59, %v982_v12  ;;  %v991_v21 = vshll.u32 %v2847_v62, %v982_v12 }
 0x369   : > { %v994_v39 = vshll.u32 %v2842_v44, %v982_v12  ;;  %v997_v24 = vshll.u32 %v2843_v46, %v982_v12  ;;  %vm1000_vm9 = vcmp.lt.s32.totalorder %v981_v6, 1  ;;  %vm1001_vm10 = vcmp.lt.s32.totalorder %v981_v6, 2 }
 0x36a   : > { %v986_v26 = vshrl.u32 %v2846_v59, %v983_v16  ;;  %v989_v27 = vshrl.u32 %v2847_v62, %v983_v16  ;;  %v992_v50 = vshrl.u32 %v2842_v44, %v983_v16  ;;  %v984_v23 = vshrl.u32 %v2845_v57, %v983_v16 }
 0x36b   : > { %v995_v4 = vshrl.u32 %v2843_v46, %v983_v16  ;;  %v998_v30 = vshrl.u32 %v2844_v51, %v983_v16  ;;  %v1087_v35 = vsub.s32 32, %v1086_v29  ;;  %vm1002_vm12 = vcmp.lt.s32.totalorder %v981_v6, 3 }
 0x36c   : > { %v987_v31 = vor.u32 %v986_v26, %v985_v18  ;;  %v990_v22 = vor.u32 %v989_v27, %v988_v17  ;;  %v993_v33 = vor.u32 %v992_v50, %v991_v21  ;;  %vm1003_vm13 = vcmp.lt.s32.totalorder %v981_v6, 4 }
 0x36d   : > { %v996_v20 = vor.u32 %v995_v4, %v994_v39  ;;  %v999_v38 = vor.u32 %v998_v30, %v997_v24  ;;  %v1089_v32 = vshll.u32 %v2845_v57, %v1086_v29  ;;  %v1090_v55 = vshrl.u32 %v2846_v59, %v1087_v35 }
 0x36e   : > { %v1004_v40 = vsel %vm1000_vm9, %v984_v23, %v987_v31  ;;  %v1005_v28 = vsel %vm1003_vm13, %v993_v33, 2102212464  ;;  %v1008_v36 = vsel %vm1000_vm9, %v987_v31, %v990_v22  ;;  %v1012_v42 = vsel %vm1000_vm9, %v990_v22, %v993_v33 }
 0x36f   : > { %v1006_v47 = vsel %vm1002_vm12, %v990_v22, %v1005_v28  ;;  %v1009_v52 = vsel %vm1003_vm13, %v996_v20, 920167782  ;;  %v1013_v54 = vsel %vm1003_vm13, %v999_v38, 1326507024  ;;  %v1092_v34 = vshll.u32 %v2846_v59, %v1086_v29 }
 0x370   : > { %v1010_v49 = vsel %vm1002_vm12, %v993_v33, %v1009_v52  ;;  %v1014_v41 = vsel %vm1002_vm12, %v996_v20, %v1013_v54  ;;  %v1007_v45 = vsel %vm1001_vm10, %v1004_v40, %v1006_v47  ;;  %v1093_v60 = vshrl.u32 %v2847_v62, %v1087_v35 }
 0x371   : > { %v1011_v43 = vsel %vm1001_vm10, %v1008_v36, %v1010_v49  ;;  %v1015_v56 = vsel %vm1001_vm10, %v1012_v42, %v1014_v41  ;;  %v1091_v1 = vor.u32 %v1090_v55, %v1089_v32  ;;  %v1095_v9 = vshll.u32 %v2847_v62, %v1086_v29 }
 0x372   : > { %v3207_v63 = vmul.u32.u64.low %v3181_v14, %v1015_v56  ;;  %v3208_v2 = vmul.u32.u64.high %v3181_v14, %v1015_v56, %v3207_v63  ;;  %v3211_v3 = vmul.u32.u64.low %v3181_v14, %v1011_v43  ;;  %v3212_v8 = vmul.u32.u64.high %v3181_v14, %v1011_v43, %v3211_v3 }
 0x373   : > { %v1094_v0 = vor.u32 %v1093_v60, %v1092_v34  ;;  %v1096_v53 = vshrl.u32 %v2842_v44, %v1087_v35  ;;  %v1098_v37 = vshll.u32 %v2842_v44, %v1086_v29  ;;  %v1099_v7 = vshrl.u32 %v2843_v46, %v1087_v35 }
 0x374   : > { %v1102_v10 = vshrl.u32 %v2844_v51, %v1087_v35  ;;  %v1023_v6 = vmul.u32 %v3181_v14, %v1007_v45  ;;  %v1088_v12 = vshrl.u32 %v2845_v57, %v1087_v35  ;;  %v1101_v16 = vshll.u32 %v2843_v46, %v1086_v29 }
 0x375   : > { %v1097_v13 = vor.u32 %v1096_v53, %v1095_v9  ;;  %vm1025_vm14 = vc.u32 %v3208_v2, %v3211_v3  ;;  %v1026_v18 = vadd.s32 1, %v3212_v8  ;;  %v1100_v17 = vor.u32 %v1099_v7, %v1098_v37 }
 0x376   : > { %vm1104_vm15 = vcmp.lt.s32.totalorder %v3184_v19, 1  ;;  %v1103_v21 = vor.u32 %v1102_v10, %v1101_v16  ;;  %vm1106_vm0 = vcmp.lt.s32.totalorder %v3184_v19, 3  ;;  %vm1107_vm1 = vcmp.lt.s32.totalorder %v3184_v19, 4 }
 0x377   : > { %v1112_v15 = vsel %vm1104_vm15, %v1091_v1, %v1094_v0  ;;  %v1027_v14 = vsel %vm1025_vm14, %v1026_v18, %v3212_v8  ;;  %v1109_v39 = vsel %vm1107_vm1, %v1097_v13, 2102212464  ;;  %v1113_v24 = vsel %vm1107_vm1, %v1100_v17, 920167782 }
 0x378   : > { %v1116_v26 = vsel %vm1104_vm15, %v1094_v0, %v1097_v13  ;;  %v1028_v27 = vadd.s32 %v1027_v14, %v1023_v6  ;;  %vm1105_vm2 = vcmp.lt.s32.totalorder %v3184_v19, 2  ;;  %v1114_v29 = vsel %vm1106_vm0, %v1097_v13, %v1113_v24 }
 0x379   : > { %v1117_v50 = vsel %vm1107_vm1, %v1103_v21, 1326507024  ;;  %v1108_v23 = vsel %vm1104_vm15, %v1088_v12, %v1091_v1  ;;  %v1110_v4 = vsel %vm1106_vm0, %v1094_v0, %v1109_v39  ;;  %v1115_v30 = vsel %vm1105_vm2, %v1112_v15, %v1114_v29 }
 0x37a   : > { %v1118_v31 = vsel %vm1106_vm0, %v1100_v17, %v1117_v50  ;;  %v1029_v22 = vadd.s32 536870912, %v1028_v27  ;;  %v3229_v35 = vmul.u32.u64.low %v1120_v11, %v1115_v30  ;;  %v3230_v20 = vmul.u32.u64.high %v1120_v11, %v1115_v30, %v3229_v35 }
 0x37b   : > { %v1119_v33 = vsel %vm1105_vm2, %v1116_v26, %v1118_v31  ;;  %v1111_v36 = vsel %vm1105_vm2, %v1108_v23, %v1110_v4  ;;  %v1024_v1 = vadd.s32 %v3211_v3, %v3208_v2  ;;  %vm1073_vm9 = vcmp.le.f32.partialorder %v1072_v25, 0.7853982 }
 0x37c   : > { %v3232_v38 = vmul.u32.u64.low %v1120_v11, %v1119_v33  ;;  %v3233_v40 = vmul.u32.u64.high %v1120_v11, %v1119_v33, %v3232_v38  ;;  %v1030_v28 = vshrl.u32 %v1029_v22, 30  ;;  %v1130_v47 = vadd.s32 1, %v3230_v20 }
 0x37d   : > { %v1127_v19 = vmul.u32 %v1120_v11, %v1111_v36  ;;  %vm1060_vm14 = vweird.f32 %v3169_v58  ;;  %vm1164_vm2 = vweird.f32 %v3171_v61 }
 0x37e   : > { %v1031_v42 = vshll.u32 %v1030_v28, 30  ;;  %vm1129_vm3 = vc.u32 %v3233_v40, %v3229_v35  ;;  %v1128_v15 = vadd.s32 %v3229_v35, %v3233_v40  ;;  %v1054_v3 = vsub.s32 4, %v1030_v28 }
 0x37f   : > { %v1131_v54 = vsel %vm1129_vm3, %v1130_v47, %v3230_v20 }
 0x380   : > { %v1032_v52 = vsub.s32 %v1028_v27, %v1031_v42  ;;  %v1132_v32 = vadd.s32 %v1131_v54, %v1127_v19  ;;  %v1055_v30 = vsel %vm970_vm6, %v1054_v3, %v1030_v28 }
 0x381   : > { %v1057_v20 = vsel %vm969_vm7, 0, %v1055_v30 }
 0x382   : > { %v1034_v49 = vsub.s32 0, %v1032_v52  ;;  %v1133_v41 = vadd.s32 536870912, %v1132_v32  ;;  %v1061_v36 = vadd.s32 3, %v1057_v20 }
 0x384   : > { %v2586_v55 = vmin.u32 %v1034_v49, %v1032_v52  ;;  %v1134_v34 = vshrl.u32 %v1133_v41, 30  ;;  %v1062_v19 = vand.u32 3, %v1061_v36 }
 0x386   : > { %v1036_v45 = vclz %v2586_v55  ;;  %v1135_v43 = vshll.u32 %v1134_v34, 30  ;;  %v1158_v40 = vsub.s32 4, %v1134_v34  ;;  %vm1067_vm10 = vcmp.eq.s32.totalorder %v1062_v19, 2 }
 0x387   : > { %vm1064_vm12 = vcmp.eq.s32.totalorder %v1062_v19, 0  ;;  %vm1063_vm13 = vcmp.lt.s32.totalorder %v1062_v19, 2 }
 0x388   : > { %v2587_v56 = vadd.s32 4294967294, %v1036_v45  ;;  %v1136_v60 = vsub.s32 %v1132_v32, %v1135_v43  ;;  %v1159_v48 = vsel %vm1074_vm8, %v1158_v40, %v1134_v34 }
 0x389   : > { %v1161_v54 = vsel %vm1073_vm9, 0, %v1159_v48 }
 0x38a   : > { %vm2588_vm4 = vcmp.lt.s32.totalorder %v2587_v56, 0  ;;  %v1138_v8 = vsub.s32 0, %v1136_v60  ;;  %v1165_v55 = vadd.s32 3, %v1161_v54 }
 0x38b   : > { %v1039_v63 = vsel %vm2588_vm4, 0, %v2587_v56 }
 0x38c   : > { %v1040_v0 = vsub.s32 32, %v1039_v63  ;;  %v1044_v9 = vsub.s32 4294967266, %v1039_v63  ;;  %v2590_v53 = vmin.u32 %v1138_v8, %v1136_v60  ;;  %v1041_v37 = vshll.u32 %v1032_v52, %v1039_v63 }
 0x38d   : > { %v1166_v56 = vand.u32 3, %v1165_v55 }
 0x38e   : > { %v1042_v7 = vshrl.u32 %v1024_v1, %v1040_v0  ;;  %v1045_v10 = vadd.s32 127, %v1044_v9  ;;  %v1140_v11 = vclz %v2590_v53 }
 0x38f   : > { %vm1171_vm15 = vcmp.eq.s32.totalorder %v1166_v56, 2  ;;  %vm1168_vm0 = vcmp.eq.s32.totalorder %v1166_v56, 0  ;;  %vm1167_vm1 = vcmp.lt.s32.totalorder %v1166_v56, 2 }
 0x390   : > { %v1043_v6 = vor.u32 %v1042_v7, %v1041_v37  ;;  %v1046_v12 = vshll.u32 %v1045_v10, 23  ;;  %v2591_v13 = vadd.s32 4294967294, %v1140_v11  ;;  %v1183_v7 = vpop.permute.xlu1 %1182 }
 0x392   : > { %v1047_v16 = vor.u32 4788187, %v1046_v12  ;;  %vm2592_vm5 = vcmp.lt.s32.totalorder %v2591_v13, 0  ;;  %v1050_v17 = vcvt.s32.f32 %v1043_v6 }
 0x393   : > { %v1143_v21 = vsel %vm2592_vm5, 0, %v2591_v13 }
 0x394   : > { %v1048_v18 = vand.u32 2147483647, %v1047_v16  ;;  %v1144_v14 = vsub.s32 32, %v1143_v21  ;;  %v1148_v39 = vsub.s32 4294967266, %v1143_v21  ;;  %v1145_v24 = vshll.u32 %v1136_v60, %v1143_v21 }
 0x396   : > { %v1051_v2 = vmul.f32 %v1050_v17, %v1048_v18  ;;  %v1146_v26 = vshrl.u32 %v1128_v15, %v1144_v14  ;;  %v1149_v27 = vadd.s32 127, %v1148_v39 }
 0x398   : > { %v1052_v29 = vxor.u32 2147483648, %v1051_v2  ;;  %v1147_v50 = vor.u32 %v1146_v26, %v1145_v24  ;;  %v1150_v23 = vshll.u32 %v1149_v27, 23 }
 0x39a   : > { %v1053_v4 = vsel %vm970_vm6, %v1052_v29, %v1051_v2  ;;  %v1151_v22 = vor.u32 4788187, %v1150_v23  ;;  %v1154_v35 = vcvt.s32.f32 %v1147_v50 }
 0x39b   : > { %v1056_v31 = vsel %vm969_vm7, %v3169_v58, %v1053_v4  ;;  %v2593_v58 = vld [vmem:[%s3623_s3 + $0x10] sm:$0xff] }
 0x39c   : > { %2760 = vcosq.f32 %v1056_v31  ;;  %v1152_v33 = vand.u32 2147483647, %v1151_v22 }
 0x39d   : > { %2762 = vsinq.f32 %v1056_v31 }
 0x39e   : > { %v1155_v38 = vmul.f32 %v1154_v35, %v1152_v33 }
 0x3a0   : > { %v1156_v42 = vxor.u32 2147483648, %v1155_v38 }
 0x3a2   : > { %v1157_v47 = vsel %vm1074_vm8, %v1156_v42, %v1155_v38 }
 0x3a3   : > { %v1160_v28 = vsel %vm1073_vm9, %v3171_v61, %v1157_v47 }
 0x3a4   : > { %2764 = vcosq.f32 %v1160_v28 }
 0x3a5   : > { %2766 = vsinq.f32 %v1160_v28 }
 0x3a6   : > { %v2761_v52 = vpop.eup %2760 }
 0x3a7   : > { %v2763_v32 = vpop.eup %2762  ;;  %v1068_v49 = vxor.u32 2147483648, %v2761_v52 }
 0x3a8   : > { %v1065_v41 = vxor.u32 2147483648, %v2763_v32 }
 0x3a9   : > { %v1069_v45 = vsel %vm1067_vm10, %v1068_v49, %v2763_v32 }
 0x3aa   : > { %v1066_v43 = vsel %vm1064_vm12, %v2761_v52, %v1065_v41 }
 0x3ab   : > { %v1070_v25 = vsel %vm1063_vm13, %v1066_v43, %v1069_v45 }
 0x3ac   : > { %v1071_v34 = vsel %vm1060_vm14, nan, %v1070_v25 }
 0x3ae   : > { %v2765_v60 = vpop.eup %2764 }
 0x3af   : > { %v2767_v63 = vpop.eup %2766  ;;  %v1172_v8 = vxor.u32 2147483648, %v2765_v60 }
 0x3b0   : > { %v1169_v1 = vxor.u32 2147483648, %v2767_v63 }
 0x3b1   : > { %v1173_v0 = vsel %vm1171_vm15, %v1172_v8, %v2767_v63 }
 0x3b2   : > { %v1170_v9 = vsel %vm1168_vm0, %v2765_v60, %v1169_v1 }
 0x3b3   : > { %v1174_v53 = vsel %vm1167_vm1, %v1170_v9, %v1173_v0 }
 0x3b4   : > { %v1175_v37 = vsel %vm1164_vm2, nan, %v1174_v53 }
 0x3b5   : > { %1188 = vmatprep.subr.mxu1 %v1175_v37 }
 0x3b6   : > { %1189 = vmatpush1.msra.mxu1 %v1071_v34 }
 0x3b7   : > { %2595 = vmatmul.mubr.msk.f32.vlgmr.msra.gmra.mrb[4].mxu1 %vm602_vm11, %v2593_v58 }
 0x3b8   : > { %1543 = vmatprep.mubr.f32.mxu1 %v2840_v5 }
 0x48a   : > { %v1254_v10 = vpop.f32.mrb[4].mxu1 }
 0x48b   : > { %v3255_v11 = vadd.f32 %v1254_v10, %v1183_v7  ;;  %v1256_v6 = vpop.f32.mrb[5].mxu1 }
 0x48c   : > { %v3257_v12 = vadd.f32 %v1256_v6, %v1183_v7 }
 0x48d   : > { %v1259_v61 = vand.u32 2147483647, %v3255_v11  ;;  %v1262_v13 = vand.u32 2139095040, %v3255_v11  ;;  %vm1261_vm2 = vcmp.lt.s32.totalorder %v3255_v11, 0 }
 0x48e   : > { %v1366_v16 = vand.u32 2139095040, %v3257_v12  ;;  %v1363_v21 = vand.u32 2147483647, %v3257_v12 }
 0x48f   : > { %v1263_v18 = vshrl.u32 %v1262_v13, 23  ;;  %v1266_v17 = vand.u32 8388607, %v1259_v61 }
 0x490   : > { %v1367_v15 = vshrl.u32 %v1366_v16, 23  ;;  %v1370_v24 = vand.u32 8388607, %v1363_v21 }
 0x491   : > { %v2596_v14 = vadd.s32 4294967169, %v1263_v18  ;;  %v1267_v3 = vor.u32 8388608, %v1266_v17 }
 0x492   : > { %v2600_v39 = vadd.s32 4294967169, %v1367_v15  ;;  %v1371_v30 = vor.u32 8388608, %v1370_v24 }
 0x493   : > { %v1269_v2 = vadd.s32 1, %v2596_v14  ;;  %v3267_v4 = vshll.u32 %v1267_v3, 8 }
 0x494   : > { %v1373_v26 = vadd.s32 1, %v2600_v39 }
 0x495   : > { %vm1270_vm3 = vcmp.gt.s32.totalorder %v1269_v2, 0 }
 0x496   : > { %v1271_v27 = vsel %vm1270_vm3, %v1269_v2, 0  ;;  %vm1374_vm4 = vcmp.gt.s32.totalorder %v1373_v26, 0  ;;  %vm1260_vm3 = vcmp.le.f32.partialorder %v1259_v61, 0.7853982 }
 0x497   : > { %v1272_v29 = vshrl.u32 %v1271_v27, 5  ;;  %v1273_v50 = vand.u32 31, %v1271_v27  ;;  %v1375_v23 = vsel %vm1374_vm4, %v1373_v26, 0  ;;  %v1411_v27 = vshll.u32 %v1371_v30, 8 }
 0x498   : > { %v3270_v33 = vshrl.u32 %v1375_v23, 5  ;;  %v1377_v35 = vand.u32 31, %v1375_v23  ;;  %vm1365_vm4 = vcmp.lt.s32.totalorder %v3257_v12, 0 }
 0x499   : > { %v1274_v31 = vsub.s32 32, %v1273_v50  ;;  %v1276_v22 = vshll.u32 %v2845_v57, %v1273_v50  ;;  %v1279_v20 = vshll.u32 %v2846_v59, %v1273_v50  ;;  %v1282_v38 = vshll.u32 %v2847_v62, %v1273_v50 }
 0x49a   : > { %v1285_v40 = vshll.u32 %v2842_v44, %v1273_v50  ;;  %v1288_v36 = vshll.u32 %v2843_v46, %v1273_v50  ;;  %vm1291_vm5 = vcmp.lt.s32.totalorder %v1272_v29, 1  ;;  %vm1292_vm6 = vcmp.lt.s32.totalorder %v1272_v29, 2 }
 0x49b   : > { %v1277_v42 = vshrl.u32 %v2846_v59, %v1274_v31  ;;  %v1280_v47 = vshrl.u32 %v2847_v62, %v1274_v31  ;;  %v1283_v48 = vshrl.u32 %v2842_v44, %v1274_v31  ;;  %v1275_v28 = vshrl.u32 %v2845_v57, %v1274_v31 }
 0x49c   : > { %v1286_v19 = vshrl.u32 %v2843_v46, %v1274_v31  ;;  %v1289_v52 = vshrl.u32 %v2844_v51, %v1274_v31  ;;  %v1378_v41 = vsub.s32 32, %v1377_v35  ;;  %vm1293_vm7 = vcmp.lt.s32.totalorder %v1272_v29, 3 }
 0x49d   : > { %v1278_v54 = vor.u32 %v1277_v42, %v1276_v22  ;;  %v1281_v32 = vor.u32 %v1280_v47, %v1279_v20  ;;  %v1284_v49 = vor.u32 %v1283_v48, %v1282_v38  ;;  %vm1294_vm8 = vcmp.lt.s32.totalorder %v1272_v29, 4 }
 0x49e   : > { %v1287_v55 = vor.u32 %v1286_v19, %v1285_v40  ;;  %v1290_v45 = vor.u32 %v1289_v52, %v1288_v36  ;;  %v1380_v1 = vshll.u32 %v2845_v57, %v1377_v35  ;;  %v1381_v53 = vshrl.u32 %v2846_v59, %v1378_v41 }
 0x49f   : > { %v1295_v43 = vsel %vm1291_vm5, %v1275_v28, %v1278_v54  ;;  %v1296_v25 = vsel %vm1294_vm8, %v1284_v49, 2102212464  ;;  %v1299_v34 = vsel %vm1291_vm5, %v1278_v54, %v1281_v32  ;;  %v1303_v56 = vsel %vm1291_vm5, %v1281_v32, %v1284_v49 }
 0x4a0   : > { %v1297_v60 = vsel %vm1293_vm7, %v1281_v32, %v1296_v25  ;;  %v1300_v63 = vsel %vm1294_vm8, %v1287_v55, 920167782  ;;  %v1304_v8 = vsel %vm1294_vm8, %v1290_v45, 1326507024  ;;  %v1383_v37 = vshll.u32 %v2846_v59, %v1377_v35 }
 0x4a1   : > { %v1301_v0 = vsel %vm1293_vm7, %v1284_v49, %v1300_v63  ;;  %v1305_v9 = vsel %vm1293_vm7, %v1287_v55, %v1304_v8  ;;  %v1298_v58 = vsel %vm1292_vm6, %v1295_v43, %v1297_v60  ;;  %v1384_v6 = vshrl.u32 %v2847_v62, %v1378_v41 }
 0x4a2   : > { %v1302_v7 = vsel %vm1292_vm6, %v1299_v34, %v1301_v0  ;;  %v1306_v10 = vsel %vm1292_vm6, %v1303_v56, %v1305_v9  ;;  %v1382_v15 = vor.u32 %v1381_v53, %v1380_v1  ;;  %v1386_v39 = vshll.u32 %v2847_v62, %v1377_v35 }
 0x4a3   : > { %v3293_v13 = vmul.u32.u64.low %v3267_v4, %v1306_v10  ;;  %v3294_v16 = vmul.u32.u64.high %v3267_v4, %v1306_v10, %v3293_v13  ;;  %v3297_v18 = vmul.u32.u64.low %v3267_v4, %v1302_v7  ;;  %v3298_v17 = vmul.u32.u64.high %v3267_v4, %v1302_v7, %v3297_v18 }
 0x4a4   : > { %v1385_v14 = vor.u32 %v1384_v6, %v1383_v37  ;;  %v1387_v2 = vshrl.u32 %v2842_v44, %v1378_v41  ;;  %v1389_v3 = vshll.u32 %v2842_v44, %v1377_v35  ;;  %v1390_v24 = vshrl.u32 %v2843_v46, %v1378_v41 }
 0x4a5   : > { %v1393_v26 = vshrl.u32 %v2844_v51, %v1378_v41  ;;  %v1314_v29 = vmul.u32 %v3267_v4, %v1298_v58  ;;  %v1379_v50 = vshrl.u32 %v2845_v57, %v1378_v41  ;;  %v1392_v31 = vshll.u32 %v2843_v46, %v1377_v35 }
 0x4a6   : > { %v1388_v23 = vor.u32 %v1387_v2, %v1386_v39  ;;  %vm1316_vm9 = vc.u32 %v3294_v16, %v3297_v18  ;;  %v1317_v22 = vadd.s32 1, %v3298_v17  ;;  %v1391_v20 = vor.u32 %v1390_v24, %v1389_v3 }
 0x4a7   : > { %vm1395_vm10 = vcmp.lt.s32.totalorder %v3270_v33, 1  ;;  %v1394_v38 = vor.u32 %v1393_v26, %v1392_v31  ;;  %vm1397_vm12 = vcmp.lt.s32.totalorder %v3270_v33, 3  ;;  %vm1398_vm13 = vcmp.lt.s32.totalorder %v3270_v33, 4 }
 0x4a8   : > { %v1403_v30 = vsel %vm1395_vm10, %v1382_v15, %v1385_v14  ;;  %v1318_v4 = vsel %vm1316_vm9, %v1317_v22, %v3298_v17  ;;  %v1400_v40 = vsel %vm1398_vm13, %v1388_v23, 2102212464  ;;  %v1404_v36 = vsel %vm1398_vm13, %v1391_v20, 920167782 }
 0x4a9   : > { %v1407_v42 = vsel %vm1395_vm10, %v1385_v14, %v1388_v23  ;;  %v1319_v47 = vadd.s32 %v1318_v4, %v1314_v29  ;;  %vm1396_vm14 = vcmp.lt.s32.totalorder %v3270_v33, 2  ;;  %v1405_v35 = vsel %vm1397_vm12, %v1388_v23, %v1404_v36 }
 0x4aa   : > { %v1408_v48 = vsel %vm1398_vm13, %v1394_v38, 1326507024  ;;  %v1399_v28 = vsel %vm1395_vm10, %v1379_v50, %v1382_v15  ;;  %v1401_v19 = vsel %vm1397_vm12, %v1385_v14, %v1400_v40  ;;  %v1406_v52 = vsel %vm1396_vm14, %v1403_v30, %v1405_v35 }
 0x4ab   : > { %v1409_v54 = vsel %vm1397_vm12, %v1391_v20, %v1408_v48  ;;  %v1320_v32 = vadd.s32 536870912, %v1319_v47  ;;  %v3315_v41 = vmul.u32.u64.low %v1411_v27, %v1406_v52  ;;  %v3316_v55 = vmul.u32.u64.high %v1411_v27, %v1406_v52, %v3315_v41 }
 0x4ac   : > { %v1410_v49 = vsel %vm1396_vm14, %v1407_v42, %v1409_v54  ;;  %v1402_v34 = vsel %vm1396_vm14, %v1399_v28, %v1401_v19  ;;  %v1315_v15 = vadd.s32 %v3297_v18, %v3294_v16  ;;  %vm1364_vm5 = vcmp.le.f32.partialorder %v1363_v21, 0.7853982 }
 0x4ad   : > { %v3318_v45 = vmul.u32.u64.low %v1411_v27, %v1410_v49  ;;  %v3319_v43 = vmul.u32.u64.high %v1411_v27, %v1410_v49, %v3318_v45  ;;  %v1321_v25 = vshrl.u32 %v1320_v32, 30  ;;  %v1421_v60 = vadd.s32 1, %v3316_v55 }
 0x4ae   : > { %v1418_v33 = vmul.u32 %v1411_v27, %v1402_v34  ;;  %vm1351_vm9 = vweird.f32 %v3255_v11  ;;  %vm1455_vm14 = vweird.f32 %v3257_v12 }
 0x4af   : > { %v1322_v56 = vshll.u32 %v1321_v25, 30  ;;  %vm1420_vm15 = vc.u32 %v3319_v43, %v3315_v41  ;;  %v1419_v30 = vadd.s32 %v3315_v41, %v3319_v43  ;;  %v1345_v18 = vsub.s32 4, %v1321_v25 }
 0x4b0   : > { %v1422_v8 = vsel %vm1420_vm15, %v1421_v60, %v3316_v55 }
 0x4b1   : > { %v1323_v63 = vsub.s32 %v1319_v47, %v1322_v56  ;;  %v1423_v1 = vadd.s32 %v1422_v8, %v1418_v33  ;;  %v1346_v52 = vsel %vm1261_vm2, %v1345_v18, %v1321_v25 }
 0x4b2   : > { %v1348_v55 = vsel %vm1260_vm3, 0, %v1346_v52 }
 0x4b3   : > { %v1325_v0 = vsub.s32 0, %v1323_v63  ;;  %v1424_v9 = vadd.s32 536870912, %v1423_v1  ;;  %v1352_v34 = vadd.s32 3, %v1348_v55 }
 0x4b5   : > { %v2597_v53 = vmin.u32 %v1325_v0, %v1323_v63  ;;  %v1425_v37 = vshrl.u32 %v1424_v9, 30  ;;  %v1353_v33 = vand.u32 3, %v1352_v34 }
 0x4b7   : > { %v1327_v58 = vclz %v2597_v53  ;;  %v1426_v7 = vshll.u32 %v1425_v37, 30  ;;  %v1449_v43 = vsub.s32 4, %v1425_v37  ;;  %vm1358_vm6 = vcmp.eq.s32.totalorder %v1353_v33, 2 }
 0x4b8   : > { %vm1355_vm7 = vcmp.eq.s32.totalorder %v1353_v33, 0  ;;  %vm1354_vm8 = vcmp.lt.s32.totalorder %v1353_v33, 2 }
 0x4b9   : > { %v2598_v10 = vadd.s32 4294967294, %v1327_v58  ;;  %v1427_v6 = vsub.s32 %v1423_v1, %v1426_v7  ;;  %v1450_v61 = vsel %vm1365_vm4, %v1449_v43, %v1425_v37 }
 0x4ba   : > { %v1452_v8 = vsel %vm1364_vm5, 0, %v1450_v61 }
 0x4bb   : > { %vm2599_vm0 = vcmp.lt.s32.totalorder %v2598_v10, 0  ;;  %v1429_v17 = vsub.s32 0, %v1427_v6  ;;  %v1456_v53 = vadd.s32 3, %v1452_v8 }
 0x4bc   : > { %v1330_v13 = vsel %vm2599_vm0, 0, %v2598_v10 }
 0x4bd   : > { %v1331_v14 = vsub.s32 32, %v1330_v13  ;;  %v1335_v39 = vsub.s32 4294967266, %v1330_v13  ;;  %v2601_v2 = vmin.u32 %v1429_v17, %v1427_v6  ;;  %v1332_v3 = vshll.u32 %v1323_v63, %v1330_v13 }
 0x4be   : > { %v1457_v10 = vand.u32 3, %v1456_v53 }
 0x4bf   : > { %v1333_v24 = vshrl.u32 %v1315_v15, %v1331_v14  ;;  %v1336_v26 = vadd.s32 127, %v1335_v39  ;;  %v1431_v27 = vclz %v2601_v2 }
 0x4c0   : > { %vm1462_vm10 = vcmp.eq.s32.totalorder %v1457_v10, 2  ;;  %vm1459_vm12 = vcmp.eq.s32.totalorder %v1457_v10, 0  ;;  %vm1458_vm13 = vcmp.lt.s32.totalorder %v1457_v10, 2 }
 0x4c1   : > { %v1334_v29 = vor.u32 %v1333_v24, %v1332_v3  ;;  %v1337_v50 = vshll.u32 %v1336_v26, 23  ;;  %v2602_v23 = vadd.s32 4294967294, %v1431_v27  ;;  %v1474_v24 = vpop.permute.xlu0 %1473 }
 0x4c3   : > { %v1338_v31 = vor.u32 4788187, %v1337_v50  ;;  %vm2603_vm1 = vcmp.lt.s32.totalorder %v2602_v23, 0  ;;  %v1341_v20 = vcvt.s32.f32 %v1334_v29 }
 0x4c4   : > { %v1434_v38 = vsel %vm2603_vm1, 0, %v2602_v23 }
 0x4c5   : > { %v1339_v22 = vand.u32 2147483647, %v1338_v31  ;;  %v1435_v4 = vsub.s32 32, %v1434_v38  ;;  %v1439_v40 = vsub.s32 4294967266, %v1434_v38  ;;  %v1436_v36 = vshll.u32 %v1427_v6, %v1434_v38 }
 0x4c7   : > { %v1342_v16 = vmul.f32 %v1341_v20, %v1339_v22  ;;  %v1437_v42 = vshrl.u32 %v1419_v30, %v1435_v4  ;;  %v1440_v47 = vadd.s32 127, %v1439_v40 }
 0x4c9   : > { %v1343_v35 = vxor.u32 2147483648, %v1342_v16  ;;  %v1438_v48 = vor.u32 %v1437_v42, %v1436_v36  ;;  %v1441_v28 = vshll.u32 %v1440_v47, 23 }
 0x4cb   : > { %v1344_v19 = vsel %vm1261_vm2, %v1343_v35, %v1342_v16  ;;  %v1442_v32 = vor.u32 4788187, %v1441_v28  ;;  %v1445_v41 = vcvt.s32.f32 %v1438_v48 }
 0x4cc   : > { %v1347_v54 = vsel %vm1260_vm3, %v3255_v11, %v1344_v19  ;;  %v2604_v11 = vld [vmem:[%s3623_s3 + $0x18] sm:$0xff] }
 0x4cd   : > { %2768 = vcosq.f32 %v1347_v54  ;;  %v1443_v49 = vand.u32 2147483647, %v1442_v32 }
 0x4ce   : > { %2770 = vsinq.f32 %v1347_v54 }
 0x4cf   : > { %v1446_v45 = vmul.f32 %v1445_v41, %v1443_v49 }
 0x4d1   : > { %v1447_v56 = vxor.u32 2147483648, %v1446_v45 }
 0x4d3   : > { %v1448_v60 = vsel %vm1365_vm4, %v1447_v56, %v1446_v45 }
 0x4d4   : > { %v1451_v25 = vsel %vm1364_vm5, %v3257_v12, %v1448_v60 }
 0x4d5   : > { %2772 = vcosq.f32 %v1451_v25 }
 0x4d6   : > { %2774 = vsinq.f32 %v1451_v25 }
 0x4d7   : > { %v2769_v63 = vpop.eup %2768 }
 0x4d8   : > { %v2771_v1 = vpop.eup %2770  ;;  %v1359_v0 = vxor.u32 2147483648, %v2769_v63 }
 0x4d9   : > { %v1356_v9 = vxor.u32 2147483648, %v2771_v1 }
 0x4da   : > { %v1360_v58 = vsel %vm1358_vm6, %v1359_v0, %v2771_v1 }
 0x4db   : > { %v1357_v7 = vsel %vm1355_vm7, %v2769_v63, %v1356_v9 }
 0x4dc   : > { %v1361_v21 = vsel %vm1354_vm8, %v1357_v7, %v1360_v58 }
 0x4dd   : > { %v1362_v37 = vsel %vm1351_vm9, nan, %v1361_v21 }
 0x4df   : > { %v2773_v6 = vpop.eup %2772 }
 0x4e0   : > { %v2775_v13 = vpop.eup %2774  ;;  %v1463_v17 = vxor.u32 2147483648, %v2773_v6 }
 0x4e1   : > { %v1460_v15 = vxor.u32 2147483648, %v2775_v13 }
 0x4e2   : > { %v1464_v14 = vsel %vm1462_vm10, %v1463_v17, %v2775_v13 }
 0x4e3   : > { %v1461_v39 = vsel %vm1459_vm12, %v2773_v6, %v1460_v15 }
 0x4e4   : > { %v1465_v2 = vsel %vm1458_vm13, %v1461_v39, %v1464_v14 }
 0x4e5   : > { %v1466_v3 = vsel %vm1455_vm14, nan, %v1465_v2 }
 0x4e6   : > { %1479 = vmatprep.subr.mxu1 %v1466_v3 }
 0x4e7   : > { %1480 = vmatpush1.msra.mxu1 %v1362_v37 }
 0x4e8   : > { %2606 = vmatmul.mubr.msk.f32.vlgmr.msra.gmra.mrb[6].mxu1 %vm602_vm11, %v2604_v11 }
 0x4e9   : > { %2125 = vmatprep.mubr.f32.mxu1 %v2840_v5 }
 0x5bb   : > { %v1545_v26 = vpop.f32.mrb[6].mxu1 }
 0x5bc   : > { %v3341_v27 = vadd.f32 %v1545_v26, %v1474_v24  ;;  %v1547_v29 = vpop.f32.mrb[7].mxu1 }
 0x5bd   : > { %v3343_v50 = vadd.f32 %v1547_v29, %v1474_v24 }
 0x5be   : > { %v1550_v12 = vand.u32 2147483647, %v3341_v27  ;;  %v1553_v23 = vand.u32 2139095040, %v3341_v27  ;;  %vm1552_vm14 = vcmp.lt.s32.totalorder %v3341_v27, 0 }
 0x5bf   : > { %v1657_v31 = vand.u32 2139095040, %v3343_v50  ;;  %v1654_v38 = vand.u32 2147483647, %v3343_v50 }
 0x5c0   : > { %v1554_v22 = vshrl.u32 %v1553_v23, 23  ;;  %v1557_v20 = vand.u32 8388607, %v1550_v12 }
 0x5c1   : > { %v1658_v30 = vshrl.u32 %v1657_v31, 23  ;;  %v1661_v36 = vand.u32 8388607, %v1654_v38 }
 0x5c2   : > { %v2607_v4 = vadd.s32 4294967169, %v1554_v22  ;;  %v1558_v18 = vor.u32 8388608, %v1557_v20 }
 0x5c3   : > { %v2611_v40 = vadd.s32 4294967169, %v1658_v30  ;;  %v1662_v52 = vor.u32 8388608, %v1661_v36 }
 0x5c4   : > { %v1560_v16 = vadd.s32 1, %v2607_v4  ;;  %v3353_v19 = vshll.u32 %v1558_v18, 8 }
 0x5c5   : > { %v1664_v42 = vadd.s32 1, %v2611_v40 }
 0x5c6   : > { %vm1561_vm15 = vcmp.gt.s32.totalorder %v1560_v16, 0 }
 0x5c7   : > { %v1562_v47 = vsel %vm1561_vm15, %v1560_v16, 0  ;;  %vm1665_vm0 = vcmp.gt.s32.totalorder %v1664_v42, 0  ;;  %vm1551_vm15 = vcmp.le.f32.partialorder %v1550_v12, 0.7853982 }
 0x5c8   : > { %v1563_v35 = vshrl.u32 %v1562_v47, 5  ;;  %v1564_v48 = vand.u32 31, %v1562_v47  ;;  %v1666_v28 = vsel %vm1665_vm0, %v1664_v42, 0  ;;  %v1702_v47 = vshll.u32 %v1662_v52, 8 }
 0x5c9   : > { %v3356_v49 = vshrl.u32 %v1666_v28, 5  ;;  %v1668_v41 = vand.u32 31, %v1666_v28  ;;  %vm1656_vm0 = vcmp.lt.s32.totalorder %v3343_v50, 0 }
 0x5ca   : > { %v1565_v54 = vsub.s32 32, %v1564_v48  ;;  %v1567_v32 = vshll.u32 %v2845_v57, %v1564_v48  ;;  %v1570_v55 = vshll.u32 %v2846_v59, %v1564_v48  ;;  %v1573_v45 = vshll.u32 %v2847_v62, %v1564_v48 }
 0x5cb   : > { %v1576_v43 = vshll.u32 %v2842_v44, %v1564_v48  ;;  %v1579_v34 = vshll.u32 %v2843_v46, %v1564_v48  ;;  %vm1582_vm1 = vcmp.lt.s32.totalorder %v1563_v35, 1  ;;  %vm1583_vm2 = vcmp.lt.s32.totalorder %v1563_v35, 2 }
 0x5cc   : > { %v1568_v56 = vshrl.u32 %v2846_v59, %v1565_v54  ;;  %v1571_v60 = vshrl.u32 %v2847_v62, %v1565_v54  ;;  %v1574_v61 = vshrl.u32 %v2842_v44, %v1565_v54  ;;  %v1566_v25 = vshrl.u32 %v2845_v57, %v1565_v54 }
 0x5cd   : > { %v1577_v33 = vshrl.u32 %v2843_v46, %v1565_v54  ;;  %v1580_v63 = vshrl.u32 %v2844_v51, %v1565_v54  ;;  %v1669_v9 = vsub.s32 32, %v1668_v41  ;;  %vm1584_vm3 = vcmp.lt.s32.totalorder %v1563_v35, 3 }
 0x5ce   : > { %v1569_v8 = vor.u32 %v1568_v56, %v1567_v32  ;;  %v1572_v1 = vor.u32 %v1571_v60, %v1570_v55  ;;  %v1575_v0 = vor.u32 %v1574_v61, %v1573_v45  ;;  %vm1585_vm4 = vcmp.lt.s32.totalorder %v1563_v35, 4 }
 0x5cf   : > { %v1578_v53 = vor.u32 %v1577_v33, %v1576_v43  ;;  %v1581_v58 = vor.u32 %v1580_v63, %v1579_v34  ;;  %v1671_v15 = vshll.u32 %v2845_v57, %v1668_v41  ;;  %v1672_v2 = vshrl.u32 %v2846_v59, %v1669_v9 }
 0x5d0   : > { %v1586_v7 = vsel %vm1582_vm1, %v1566_v25, %v1569_v8  ;;  %v1587_v21 = vsel %vm1585_vm4, %v1575_v0, 2102212464  ;;  %v1590_v37 = vsel %vm1582_vm1, %v1569_v8, %v1572_v1  ;;  %v1594_v10 = vsel %vm1582_vm1, %v1572_v1, %v1575_v0 }
 0x5d1   : > { %v1588_v6 = vsel %vm1584_vm3, %v1572_v1, %v1587_v21  ;;  %v1591_v13 = vsel %vm1585_vm4, %v1578_v53, 920167782  ;;  %v1595_v17 = vsel %vm1585_vm4, %v1581_v58, 1326507024  ;;  %v1674_v3 = vshll.u32 %v2846_v59, %v1668_v41 }
 0x5d2   : > { %v1592_v14 = vsel %vm1584_vm3, %v1575_v0, %v1591_v13  ;;  %v1596_v39 = vsel %vm1584_vm3, %v1578_v53, %v1595_v17  ;;  %v1589_v11 = vsel %vm1583_vm2, %v1586_v7, %v1588_v6  ;;  %v1675_v29 = vshrl.u32 %v2847_v62, %v1669_v9 }
 0x5d3   : > { %v1593_v24 = vsel %vm1583_vm2, %v1590_v37, %v1592_v14  ;;  %v1597_v26 = vsel %vm1583_vm2, %v1594_v10, %v1596_v39  ;;  %v1673_v30 = vor.u32 %v1672_v2, %v1671_v15  ;;  %v1677_v40 = vshll.u32 %v2847_v62, %v1668_v41 }
 0x5d4   : > { %v3379_v23 = vmul.u32.u64.low %v3353_v19, %v1597_v26  ;;  %v3380_v31 = vmul.u32.u64.high %v3353_v19, %v1597_v26, %v3379_v23  ;;  %v3383_v22 = vmul.u32.u64.low %v3353_v19, %v1593_v24  ;;  %v3384_v20 = vmul.u32.u64.high %v3353_v19, %v1593_v24, %v3383_v22 }
 0x5d5   : > { %v1676_v4 = vor.u32 %v1675_v29, %v1674_v3  ;;  %v1678_v16 = vshrl.u32 %v2842_v44, %v1669_v9  ;;  %v1680_v18 = vshll.u32 %v2842_v44, %v1668_v41  ;;  %v1681_v36 = vshrl.u32 %v2843_v46, %v1669_v9 }
 0x5d6   : > { %v1684_v42 = vshrl.u32 %v2844_v51, %v1669_v9  ;;  %v1605_v35 = vmul.u32 %v3353_v19, %v1589_v11  ;;  %v1670_v48 = vshrl.u32 %v2845_v57, %v1669_v9  ;;  %v1683_v54 = vshll.u32 %v2843_v46, %v1668_v41 }
 0x5d7   : > { %v1679_v28 = vor.u32 %v1678_v16, %v1677_v40  ;;  %vm1607_vm5 = vc.u32 %v3380_v31, %v3383_v22  ;;  %v1608_v32 = vadd.s32 1, %v3384_v20  ;;  %v1682_v55 = vor.u32 %v1681_v36, %v1680_v18 }
 0x5d8   : > { %vm1686_vm6 = vcmp.lt.s32.totalorder %v3356_v49, 1  ;;  %v1685_v45 = vor.u32 %v1684_v42, %v1683_v54  ;;  %vm1688_vm7 = vcmp.lt.s32.totalorder %v3356_v49, 3  ;;  %vm1689_vm8 = vcmp.lt.s32.totalorder %v3356_v49, 4 }
 0x5d9   : > { %v1694_v52 = vsel %vm1686_vm6, %v1673_v30, %v1676_v4  ;;  %v1609_v19 = vsel %vm1607_vm5, %v1608_v32, %v3384_v20  ;;  %v1691_v43 = vsel %vm1689_vm8, %v1679_v28, 2102212464  ;;  %v1695_v34 = vsel %vm1689_vm8, %v1682_v55, 920167782 }
 0x5da   : > { %v1698_v56 = vsel %vm1686_vm6, %v1676_v4, %v1679_v28  ;;  %v1610_v60 = vadd.s32 %v1609_v19, %v1605_v35  ;;  %vm1687_vm9 = vcmp.lt.s32.totalorder %v3356_v49, 2  ;;  %v1696_v41 = vsel %vm1688_vm7, %v1679_v28, %v1695_v34 }
 0x5db   : > { %v1699_v61 = vsel %vm1689_vm8, %v1685_v45, 1326507024  ;;  %v1690_v25 = vsel %vm1686_vm6, %v1670_v48, %v1673_v30  ;;  %v1692_v33 = vsel %vm1688_vm7, %v1676_v4, %v1691_v43  ;;  %v1697_v63 = vsel %vm1687_vm9, %v1694_v52, %v1696_v41 }
 0x5dc   : > { %v1700_v8 = vsel %vm1688_vm7, %v1682_v55, %v1699_v61  ;;  %v1611_v1 = vadd.s32 536870912, %v1610_v60  ;;  %v3401_v9 = vmul.u32.u64.low %v1702_v47, %v1697_v63  ;;  %v3402_v53 = vmul.u32.u64.high %v1702_v47, %v1697_v63, %v3401_v9 }
 0x5dd   : > { %v1701_v0 = vsel %vm1687_vm9, %v1698_v56, %v1700_v8  ;;  %v1693_v37 = vsel %vm1687_vm9, %v1690_v25, %v1692_v33  ;;  %v1606_v30 = vadd.s32 %v3383_v22, %v3380_v31  ;;  %vm1655_vm1 = vcmp.le.f32.partialorder %v1654_v38, 0.7853982 }
 0x5de   : > { %v3404_v58 = vmul.u32.u64.low %v1702_v47, %v1701_v0  ;;  %v3405_v7 = vmul.u32.u64.high %v1702_v47, %v1701_v0, %v3404_v58  ;;  %v1612_v21 = vshrl.u32 %v1611_v1, 30  ;;  %v1712_v6 = vadd.s32 1, %v3402_v53 }
 0x5df   : > { %v1709_v49 = vmul.u32 %v1702_v47, %v1693_v37  ;;  %vm1642_vm5 = vweird.f32 %v3341_v27  ;;  %vm1746_vm9 = vweird.f32 %v3343_v50 }
 0x5e0   : > { %v1613_v10 = vshll.u32 %v1612_v21, 30  ;;  %vm1711_vm10 = vc.u32 %v3405_v7, %v3401_v9  ;;  %v1710_v52 = vadd.s32 %v3401_v9, %v3405_v7  ;;  %v1636_v22 = vsub.s32 4, %v1612_v21 }
 0x5e1   : > { %v1713_v17 = vsel %vm1711_vm10, %v1712_v6, %v3402_v53 }
 0x5e2   : > { %v1614_v13 = vsub.s32 %v1610_v60, %v1613_v10  ;;  %v1714_v15 = vadd.s32 %v1713_v17, %v1709_v49  ;;  %v1637_v63 = vsel %vm1552_vm14, %v1636_v22, %v1612_v21 }
 0x5e3   : > { %v1639_v53 = vsel %vm1551_vm15, 0, %v1637_v63 }
 0x5e4   : > { %v1616_v14 = vsub.s32 0, %v1614_v13  ;;  %v1715_v39 = vadd.s32 536870912, %v1714_v15  ;;  %v1643_v37 = vadd.s32 3, %v1639_v53 }
 0x5e6   : > { %v2608_v2 = vmin.u32 %v1616_v14, %v1614_v13  ;;  %v1716_v3 = vshrl.u32 %v1715_v39, 30  ;;  %v1644_v49 = vand.u32 3, %v1643_v37 }
 0x5e8   : > { %v1618_v11 = vclz %v2608_v2  ;;  %v1717_v24 = vshll.u32 %v1716_v3, 30  ;;  %v1740_v7 = vsub.s32 4, %v1716_v3  ;;  %vm1649_vm2 = vcmp.eq.s32.totalorder %v1644_v49, 2 }
 0x5e9   : > { %vm1646_vm3 = vcmp.eq.s32.totalorder %v1644_v49, 0  ;;  %vm1645_vm4 = vcmp.lt.s32.totalorder %v1644_v49, 2 }
 0x5ea   : > { %v2609_v26 = vadd.s32 4294967294, %v1618_v11  ;;  %v1718_v29 = vsub.s32 %v1714_v15, %v1717_v24  ;;  %v1741_v12 = vsel %vm1656_vm0, %v1740_v7, %v1716_v3 }
 0x5eb   : > { %v1743_v17 = vsel %vm1655_vm1, 0, %v1741_v12 }
 0x5ec   : > { %vm2610_vm12 = vcmp.lt.s32.totalorder %v2609_v26, 0  ;;  %v1720_v20 = vsub.s32 0, %v1718_v29  ;;  %v1747_v2 = vadd.s32 3, %v1743_v17 }
 0x5ed   : > { %v1621_v23 = vsel %vm2610_vm12, 0, %v2609_v26 }
 0x5ee   : > { %v1622_v4 = vsub.s32 32, %v1621_v23  ;;  %v1626_v40 = vsub.s32 4294967266, %v1621_v23  ;;  %v2612_v16 = vmin.u32 %v1720_v20, %v1718_v29  ;;  %v1623_v18 = vshll.u32 %v1614_v13, %v1621_v23 }
 0x5ef   : > { %v1748_v26 = vand.u32 3, %v1747_v2 }
 0x5f0   : > { %v1624_v36 = vshrl.u32 %v1606_v30, %v1622_v4  ;;  %v1627_v42 = vadd.s32 127, %v1626_v40  ;;  %v1722_v47 = vclz %v2612_v16 }
 0x5f1   : > { %vm1753_vm6 = vcmp.eq.s32.totalorder %v1748_v26, 2  ;;  %vm1750_vm7 = vcmp.eq.s32.totalorder %v1748_v26, 0  ;;  %vm1749_vm8 = vcmp.lt.s32.totalorder %v1748_v26, 2 }
 0x5f2   : > { %v1625_v35 = vor.u32 %v1624_v36, %v1623_v18  ;;  %v1628_v48 = vshll.u32 %v1627_v42, 23  ;;  %v2613_v28 = vadd.s32 4294967294, %v1722_v47  ;;  %v1765_v36 = vpop.permute.xlu1 %1764 }
 0x5f4   : > { %v1629_v54 = vor.u32 4788187, %v1628_v48  ;;  %vm2614_vm13 = vcmp.lt.s32.totalorder %v2613_v28, 0  ;;  %v1632_v55 = vcvt.s32.f32 %v1625_v35 }
 0x5f5   : > { %v1725_v45 = vsel %vm2614_vm13, 0, %v2613_v28 }
 0x5f6   : > { %v1630_v32 = vand.u32 2147483647, %v1629_v54  ;;  %v1726_v19 = vsub.s32 32, %v1725_v45  ;;  %v1730_v43 = vsub.s32 4294967266, %v1725_v45  ;;  %v1727_v34 = vshll.u32 %v1718_v29, %v1725_v45 }
 0x5f8   : > { %v1633_v31 = vmul.f32 %v1632_v55, %v1630_v32  ;;  %v1728_v56 = vshrl.u32 %v1710_v52, %v1726_v19  ;;  %v1731_v60 = vadd.s32 127, %v1730_v43 }
 0x5fa   : > { %v1634_v41 = vxor.u32 2147483648, %v1633_v31  ;;  %v1729_v61 = vor.u32 %v1728_v56, %v1727_v34  ;;  %v1732_v25 = vshll.u32 %v1731_v60, 23 }
 0x5fc   : > { %v1635_v33 = vsel %vm1552_vm14, %v1634_v41, %v1633_v31  ;;  %v1733_v1 = vor.u32 4788187, %v1732_v25  ;;  %v1736_v9 = vcvt.s32.f32 %v1729_v61 }
 0x5fd   : > { %v1638_v8 = vsel %vm1551_vm15, %v3341_v27, %v1635_v33  ;;  %v2615_v27 = vld [vmem:[%s3623_s3 + $0x20] sm:$0xff] }
 0x5fe   : > { %2776 = vcosq.f32 %v1638_v8  ;;  %v1734_v0 = vand.u32 2147483647, %v1733_v1 }
 0x5ff   : > { %2778 = vsinq.f32 %v1638_v8 }
 0x600   : > { %v1737_v58 = vmul.f32 %v1736_v9, %v1734_v0 }
 0x602   : > { %v1738_v10 = vxor.u32 2147483648, %v1737_v58 }
 0x604   : > { %v1739_v6 = vsel %vm1656_vm0, %v1738_v10, %v1737_v58 }
 0x605   : > { %v1742_v21 = vsel %vm1655_vm1, %v3343_v50, %v1739_v6 }
 0x606   : > { %2780 = vcosq.f32 %v1742_v21 }
 0x607   : > { %2782 = vsinq.f32 %v1742_v21 }
 0x608   : > { %v2777_v13 = vpop.eup %2776 }
 0x609   : > { %v2779_v15 = vpop.eup %2778  ;;  %v1650_v14 = vxor.u32 2147483648, %v2777_v13 }
 0x60a   : > { %v1647_v39 = vxor.u32 2147483648, %v2779_v15 }
 0x60b   : > { %v1651_v11 = vsel %vm1649_vm2, %v1650_v14, %v2779_v15 }
 0x60c   : > { %v1648_v24 = vsel %vm1646_vm3, %v2777_v13, %v1647_v39 }
 0x60d   : > { %v1652_v38 = vsel %vm1645_vm4, %v1648_v24, %v1651_v11 }
 0x60e   : > { %v1653_v3 = vsel %vm1642_vm5, nan, %v1652_v38 }
 0x610   : > { %v2781_v29 = vpop.eup %2780 }
 0x611   : > { %v2783_v23 = vpop.eup %2782  ;;  %v1754_v20 = vxor.u32 2147483648, %v2781_v29 }
 0x612   : > { %v1751_v30 = vxor.u32 2147483648, %v2783_v23 }
 0x613   : > { %v1755_v4 = vsel %vm1753_vm6, %v1754_v20, %v2783_v23 }
 0x614   : > { %v1752_v40 = vsel %vm1750_vm7, %v2781_v29, %v1751_v30 }
 0x615   : > { %v1756_v16 = vsel %vm1749_vm8, %v1752_v40, %v1755_v4 }
 0x616   : > { %v1757_v18 = vsel %vm1746_vm9, nan, %v1756_v16 }
 0x617   : > { %1770 = vmatprep.subr.mxu0 %v1757_v18 }
 0x618   : > { %1771 = vmatpush1.msra.mxu0 %v1653_v3 }
 0x619   : > { %2617 = vmatmul.mubr.msk.f32.vlgmr.msra.gmra.mrb[2].mxu0 %vm602_vm11, %v2615_v27 }
 0x61a   : > { %2424 = vmatprep.mubr.f32.mxu0 %v2840_v5 }
 0x6ec   : > { %v1836_v42 = vpop.f32.mrb[2].mxu0 }
 0x6ed   : > { %v3427_v47 = vadd.f32 %v1836_v42, %v1765_v36  ;;  %v1838_v35 = vpop.f32.mrb[3].mxu0 }
 0x6ee   : > { %v3429_v48 = vadd.f32 %v1838_v35, %v1765_v36 }
 0x6ef   : > { %v1841_v50 = vand.u32 2147483647, %v3427_v47  ;;  %v1844_v28 = vand.u32 2139095040, %v3427_v47  ;;  %vm1843_vm9 = vcmp.lt.s32.totalorder %v3427_v47, 0 }
 0x6f0   : > { %v1948_v54 = vand.u32 2139095040, %v3429_v48  ;;  %v1945_v45 = vand.u32 2147483647, %v3429_v48 }
 0x6f1   : > { %v1845_v32 = vshrl.u32 %v1844_v28, 23  ;;  %v1848_v55 = vand.u32 8388607, %v1841_v50 }
 0x6f2   : > { %v1949_v52 = vshrl.u32 %v1948_v54, 23  ;;  %v1952_v34 = vand.u32 8388607, %v1945_v45 }
 0x6f3   : > { %v2618_v19 = vadd.s32 4294967169, %v1845_v32  ;;  %v1849_v22 = vor.u32 8388608, %v1848_v55 }
 0x6f4   : > { %v2622_v43 = vadd.s32 4294967169, %v1949_v52  ;;  %v1953_v63 = vor.u32 8388608, %v1952_v34 }
 0x6f5   : > { %v1851_v31 = vadd.s32 1, %v2618_v19  ;;  %v3439_v33 = vshll.u32 %v1849_v22, 8 }
 0x6f6   : > { %v1955_v56 = vadd.s32 1, %v2622_v43 }
 0x6f7   : > { %vm1852_vm10 = vcmp.gt.s32.totalorder %v1851_v31, 0 }
 0x6f8   : > { %v1853_v60 = vsel %vm1852_vm10, %v1851_v31, 0  ;;  %vm1956_vm12 = vcmp.gt.s32.totalorder %v1955_v56, 0  ;;  %vm1842_vm10 = vcmp.le.f32.partialorder %v1841_v50, 0.7853982 }
 0x6f9   : > { %v1854_v41 = vshrl.u32 %v1853_v60, 5  ;;  %v1855_v61 = vand.u32 31, %v1853_v60  ;;  %v1957_v25 = vsel %vm1956_vm12, %v1955_v56, 0  ;;  %v1993_v60 = vshll.u32 %v1953_v63, 8 }
 0x6fa   : > { %v3442_v0 = vshrl.u32 %v1957_v25, 5  ;;  %v1959_v9 = vand.u32 31, %v1957_v25  ;;  %vm1947_vm12 = vcmp.lt.s32.totalorder %v3429_v48, 0 }
 0x6fb   : > { %v1856_v8 = vsub.s32 32, %v1855_v61  ;;  %v1858_v1 = vshll.u32 %v2845_v57, %v1855_v61  ;;  %v1861_v53 = vshll.u32 %v2846_v59, %v1855_v61  ;;  %v1864_v58 = vshll.u32 %v2847_v62, %v1855_v61 }
 0x6fc   : > { %v1867_v7 = vshll.u32 %v2842_v44, %v1855_v61  ;;  %v1870_v37 = vshll.u32 %v2843_v46, %v1855_v61  ;;  %vm1873_vm13 = vcmp.lt.s32.totalorder %v1854_v41, 1  ;;  %vm1874_vm14 = vcmp.lt.s32.totalorder %v1854_v41, 2 }
 0x6fd   : > { %v1859_v10 = vshrl.u32 %v2846_v59, %v1856_v8  ;;  %v1862_v6 = vshrl.u32 %v2847_v62, %v1856_v8  ;;  %v1865_v12 = vshrl.u32 %v2842_v44, %v1856_v8  ;;  %v1857_v21 = vshrl.u32 %v2845_v57, %v1856_v8 }
 0x6fe   : > { %v1868_v49 = vshrl.u32 %v2843_v46, %v1856_v8  ;;  %v1871_v13 = vshrl.u32 %v2844_v51, %v1856_v8  ;;  %v1960_v39 = vsub.s32 32, %v1959_v9  ;;  %vm1875_vm15 = vcmp.lt.s32.totalorder %v1854_v41, 3 }
 0x6ff   : > { %v1860_v17 = vor.u32 %v1859_v10, %v1858_v1  ;;  %v1863_v15 = vor.u32 %v1862_v6, %v1861_v53  ;;  %v1866_v14 = vor.u32 %v1865_v12, %v1864_v58  ;;  %vm1876_vm0 = vcmp.lt.s32.totalorder %v1854_v41, 4 }
 0x700   : > { %v1869_v2 = vor.u32 %v1868_v49, %v1867_v7  ;;  %v1872_v11 = vor.u32 %v1871_v13, %v1870_v37  ;;  %v1962_v30 = vshll.u32 %v2845_v57, %v1959_v9  ;;  %v1963_v16 = vshrl.u32 %v2846_v59, %v1960_v39 }
 0x701   : > { %v1877_v24 = vsel %vm1873_vm13, %v1857_v21, %v1860_v17  ;;  %v1878_v38 = vsel %vm1876_vm0, %v1866_v14, 2102212464  ;;  %v1881_v3 = vsel %vm1873_vm13, %v1860_v17, %v1863_v15  ;;  %v1885_v26 = vsel %vm1873_vm13, %v1863_v15, %v1866_v14 }
 0x702   : > { %v1879_v29 = vsel %vm1875_vm15, %v1863_v15, %v1878_v38  ;;  %v1882_v23 = vsel %vm1876_vm0, %v1869_v2, 920167782  ;;  %v1886_v20 = vsel %vm1876_vm0, %v1872_v11, 1326507024  ;;  %v1965_v18 = vshll.u32 %v2846_v59, %v1959_v9 }
 0x703   : > { %v1883_v4 = vsel %vm1875_vm15, %v1866_v14, %v1882_v23  ;;  %v1887_v40 = vsel %vm1875_vm15, %v1869_v2, %v1886_v20  ;;  %v1880_v27 = vsel %vm1874_vm14, %v1877_v24, %v1879_v29  ;;  %v1966_v35 = vshrl.u32 %v2847_v62, %v1960_v39 }
 0x704   : > { %v1884_v36 = vsel %vm1874_vm14, %v1881_v3, %v1883_v4  ;;  %v1888_v42 = vsel %vm1874_vm14, %v1885_v26, %v1887_v40  ;;  %v1964_v52 = vor.u32 %v1963_v16, %v1962_v30  ;;  %v1968_v43 = vshll.u32 %v2847_v62, %v1959_v9 }
 0x705   : > { %v3465_v28 = vmul.u32.u64.low %v3439_v33, %v1888_v42  ;;  %v3466_v54 = vmul.u32.u64.high %v3439_v33, %v1888_v42, %v3465_v28  ;;  %v3469_v32 = vmul.u32.u64.low %v3439_v33, %v1884_v36  ;;  %v3470_v55 = vmul.u32.u64.high %v3439_v33, %v1884_v36, %v3469_v32 }
 0x706   : > { %v1967_v19 = vor.u32 %v1966_v35, %v1965_v18  ;;  %v1969_v31 = vshrl.u32 %v2842_v44, %v1960_v39  ;;  %v1971_v22 = vshll.u32 %v2842_v44, %v1959_v9  ;;  %v1972_v34 = vshrl.u32 %v2843_v46, %v1960_v39 }
 0x707   : > { %v1975_v56 = vshrl.u32 %v2844_v51, %v1960_v39  ;;  %v1896_v41 = vmul.u32 %v3439_v33, %v1880_v27  ;;  %v1961_v61 = vshrl.u32 %v2845_v57, %v1960_v39  ;;  %v1974_v8 = vshll.u32 %v2843_v46, %v1959_v9 }
 0x708   : > { %v1970_v25 = vor.u32 %v1969_v31, %v1968_v43  ;;  %vm1898_vm1 = vc.u32 %v3466_v54, %v3469_v32  ;;  %v1899_v1 = vadd.s32 1, %v3470_v55  ;;  %v1973_v53 = vor.u32 %v1972_v34, %v1971_v22 }
 0x709   : > { %vm1977_vm2 = vcmp.lt.s32.totalorder %v3442_v0, 1  ;;  %v1976_v58 = vor.u32 %v1975_v56, %v1974_v8  ;;  %vm1979_vm3 = vcmp.lt.s32.totalorder %v3442_v0, 3  ;;  %vm1980_vm4 = vcmp.lt.s32.totalorder %v3442_v0, 4 }
 0x70a   : > { %v1985_v63 = vsel %vm1977_vm2, %v1964_v52, %v1967_v19  ;;  %v1900_v33 = vsel %vm1898_vm1, %v1899_v1, %v3470_v55  ;;  %v1982_v7 = vsel %vm1980_vm4, %v1970_v25, 2102212464  ;;  %v1986_v37 = vsel %vm1980_vm4, %v1973_v53, 920167782 }
 0x70b   : > { %v1989_v10 = vsel %vm1977_vm2, %v1967_v19, %v1970_v25  ;;  %v1901_v6 = vadd.s32 %v1900_v33, %v1896_v41  ;;  %vm1978_vm5 = vcmp.lt.s32.totalorder %v3442_v0, 2  ;;  %v1987_v9 = vsel %vm1979_vm3, %v1970_v25, %v1986_v37 }
 0x70c   : > { %v1990_v12 = vsel %vm1980_vm4, %v1976_v58, 1326507024  ;;  %v1981_v21 = vsel %vm1977_vm2, %v1961_v61, %v1964_v52  ;;  %v1983_v49 = vsel %vm1979_vm3, %v1967_v19, %v1982_v7  ;;  %v1988_v13 = vsel %vm1978_vm5, %v1985_v63, %v1987_v9 }
 0x70d   : > { %v1991_v17 = vsel %vm1979_vm3, %v1973_v53, %v1990_v12  ;;  %v1902_v15 = vadd.s32 536870912, %v1901_v6  ;;  %v3487_v39 = vmul.u32.u64.low %v1993_v60, %v1988_v13  ;;  %v3488_v2 = vmul.u32.u64.high %v1993_v60, %v1988_v13, %v3487_v39 }
 0x70e   : > { %v1992_v14 = vsel %vm1978_vm5, %v1989_v10, %v1991_v17  ;;  %v1984_v3 = vsel %vm1978_vm5, %v1981_v21, %v1983_v49  ;;  %v1897_v52 = vadd.s32 %v3469_v32, %v3466_v54  ;;  %vm1946_vm13 = vcmp.le.f32.partialorder %v1945_v45, 0.7853982 }
 0x70f   : > { %v3490_v11 = vmul.u32.u64.low %v1993_v60, %v1992_v14  ;;  %v3491_v24 = vmul.u32.u64.high %v1993_v60, %v1992_v14, %v3490_v11  ;;  %v1903_v38 = vshrl.u32 %v1902_v15, 30  ;;  %v2003_v29 = vadd.s32 1, %v3488_v2 }
 0x710   : > { %v2000_v0 = vmul.u32 %v1993_v60, %v1984_v3  ;;  %vm1933_vm1 = vweird.f32 %v3427_v47  ;;  %vm2037_vm5 = vweird.f32 %v3429_v48 }
 0x711   : > { %v1904_v26 = vshll.u32 %v1903_v38, 30  ;;  %vm2002_vm6 = vc.u32 %v3491_v24, %v3487_v39  ;;  %v2001_v63 = vadd.s32 %v3487_v39, %v3491_v24  ;;  %v1927_v32 = vsub.s32 4, %v1903_v38 }
 0x712   : > { %v2004_v20 = vsel %vm2002_vm6, %v2003_v29, %v3488_v2 }
 0x713   : > { %v1905_v23 = vsub.s32 %v1901_v6, %v1904_v26  ;;  %v2005_v30 = vadd.s32 %v2004_v20, %v2000_v0  ;;  %v1928_v13 = vsel %vm1843_vm9, %v1927_v32, %v1903_v38 }
 0x714   : > { %v1930_v2 = vsel %vm1842_vm10, 0, %v1928_v13 }
 0x715   : > { %v1907_v4 = vsub.s32 0, %v1905_v23  ;;  %v2006_v40 = vadd.s32 536870912, %v2005_v30  ;;  %v1934_v3 = vadd.s32 3, %v1930_v2 }
 0x717   : > { %v2619_v16 = vmin.u32 %v1907_v4, %v1905_v23  ;;  %v2007_v18 = vshrl.u32 %v2006_v40, 30  ;;  %v1935_v0 = vand.u32 3, %v1934_v3 }
 0x719   : > { %v1909_v27 = vclz %v2619_v16  ;;  %v2008_v36 = vshll.u32 %v2007_v18, 30  ;;  %v2031_v24 = vsub.s32 4, %v2007_v18  ;;  %vm1940_vm14 = vcmp.eq.s32.totalorder %v1935_v0, 2 }
 0x71a   : > { %vm1937_vm15 = vcmp.eq.s32.totalorder %v1935_v0, 0  ;;  %vm1936_vm0 = vcmp.lt.s32.totalorder %v1935_v0, 2 }
 0x71b   : > { %v2620_v42 = vadd.s32 4294967294, %v1909_v27  ;;  %v2009_v35 = vsub.s32 %v2005_v30, %v2008_v36  ;;  %v2032_v50 = vsel %vm1947_vm12, %v2031_v24, %v2007_v18 }
 0x71c   : > { %v2034_v20 = vsel %vm1946_vm13, 0, %v2032_v50 }
 0x71d   : > { %vm2621_vm7 = vcmp.lt.s32.totalorder %v2620_v42, 0  ;;  %v2011_v55 = vsub.s32 0, %v2009_v35  ;;  %v2038_v16 = vadd.s32 3, %v2034_v20 }
 0x71e   : > { %v1912_v28 = vsel %vm2621_vm7, 0, %v2620_v42 }
 0x71f   : > { %v1913_v19 = vsub.s32 32, %v1912_v28  ;;  %v1917_v43 = vsub.s32 4294967266, %v1912_v28  ;;  %v2623_v31 = vmin.u32 %v2011_v55, %v2009_v35  ;;  %v1914_v22 = vshll.u32 %v1905_v23, %v1912_v28 }
 0x720   : > { %v2039_v42 = vand.u32 3, %v2038_v16 }
 0x721   : > { %v1915_v34 = vshrl.u32 %v1897_v52, %v1913_v19  ;;  %v1918_v56 = vadd.s32 127, %v1917_v43  ;;  %v2013_v60 = vclz %v2623_v31 }
 0x722   : > { %vm2044_vm2 = vcmp.eq.s32.totalorder %v2039_v42, 2  ;;  %vm2041_vm3 = vcmp.eq.s32.totalorder %v2039_v42, 0  ;;  %vm2040_vm4 = vcmp.lt.s32.totalorder %v2039_v42, 2 }
 0x723   : > { %v1916_v41 = vor.u32 %v1915_v34, %v1914_v22  ;;  %v1919_v61 = vshll.u32 %v1918_v56, 23  ;;  %v2624_v25 = vadd.s32 4294967294, %v2013_v60  ;;  %v2056_v34 = vpop.permute.xlu0 %2055 }
 0x725   : > { %v1920_v8 = vor.u32 4788187, %v1919_v61  ;;  %vm2625_vm8 = vcmp.lt.s32.totalorder %v2624_v25, 0  ;;  %v1923_v53 = vcvt.s32.f32 %v1916_v41 }
 0x726   : > { %v2016_v58 = vsel %vm2625_vm8, 0, %v2624_v25 }
 0x727   : > { %v1921_v1 = vand.u32 2147483647, %v1920_v8  ;;  %v2017_v33 = vsub.s32 32, %v2016_v58  ;;  %v2021_v7 = vsub.s32 4294967266, %v2016_v58  ;;  %v2018_v37 = vshll.u32 %v2009_v35, %v2016_v58 }
 0x729   : > { %v1924_v54 = vmul.f32 %v1923_v53, %v1921_v1  ;;  %v2019_v10 = vshrl.u32 %v2001_v63, %v2017_v33  ;;  %v2022_v6 = vadd.s32 127, %v2021_v7 }
 0x72b   : > { %v1925_v9 = vxor.u32 2147483648, %v1924_v54  ;;  %v2020_v12 = vor.u32 %v2019_v10, %v2018_v37  ;;  %v2023_v21 = vshll.u32 %v2022_v6, 23 }
 0x72d   : > { %v1926_v49 = vsel %vm1843_vm9, %v1925_v9, %v1924_v54  ;;  %v2024_v15 = vor.u32 4788187, %v2023_v21  ;;  %v2027_v39 = vcvt.s32.f32 %v2020_v12 }
 0x72e   : > { %v1929_v17 = vsel %vm1842_vm10, %v3427_v47, %v1926_v49  ;;  %v2626_v47 = vld [vmem:[%s3623_s3 + $0x28] sm:$0xff] }
 0x72f   : > { %2784 = vcosq.f32 %v1929_v17  ;;  %v2025_v14 = vand.u32 2147483647, %v2024_v15 }
 0x730   : > { %2786 = vsinq.f32 %v1929_v17 }
 0x731   : > { %v2028_v11 = vmul.f32 %v2027_v39, %v2025_v14 }
 0x733   : > { %v2029_v26 = vxor.u32 2147483648, %v2028_v11 }
 0x735   : > { %v2030_v29 = vsel %vm1947_vm12, %v2029_v26, %v2028_v11 }
 0x736   : > { %v2033_v38 = vsel %vm1946_vm13, %v3429_v48, %v2030_v29 }
 0x737   : > { %2788 = vcosq.f32 %v2033_v38 }
 0x738   : > { %2790 = vsinq.f32 %v2033_v38 }
 0x739   : > { %v2785_v23 = vpop.eup %2784 }
 0x73a   : > { %v2787_v30 = vpop.eup %2786  ;;  %v1941_v4 = vxor.u32 2147483648, %v2785_v23 }
 0x73b   : > { %v1938_v40 = vxor.u32 2147483648, %v2787_v30 }
 0x73c   : > { %v1942_v27 = vsel %vm1940_vm14, %v1941_v4, %v2787_v30 }
 0x73d   : > { %v1939_v36 = vsel %vm1937_vm15, %v2785_v23, %v1938_v40 }
 0x73e   : > { %v1943_v45 = vsel %vm1936_vm0, %v1939_v36, %v1942_v27 }
 0x73f   : > { %v1944_v18 = vsel %vm1933_vm1, nan, %v1943_v45 }
 0x741   : > { %v2789_v35 = vpop.eup %2788 }
 0x742   : > { %v2791_v28 = vpop.eup %2790  ;;  %v2045_v55 = vxor.u32 2147483648, %v2789_v35 }
 0x743   : > { %v2042_v52 = vxor.u32 2147483648, %v2791_v28 }
 0x744   : > { %v2046_v19 = vsel %vm2044_vm2, %v2045_v55, %v2791_v28 }
 0x745   : > { %v2043_v43 = vsel %vm2041_vm3, %v2789_v35, %v2042_v52 }
 0x746   : > { %v2047_v31 = vsel %vm2040_vm4, %v2043_v43, %v2046_v19 }
 0x747   : > { %v2048_v22 = vsel %vm2037_vm5, nan, %v2047_v31 }
 0x748   : > { %2061 = vmatprep.subr.mxu1 %v2048_v22 }
 0x749   : > { %2062 = vmatpush1.msra.mxu1 %v1944_v18 }
 0x74a   : > { %2628 = vmatmul.mubr.msk.f32.vlgmr.msra.gmra.mrb[8].mxu1 %vm602_vm11, %v2626_v47 }
 0x81d   : > { %v2127_v56 = vpop.f32.mrb[8].mxu1 }
 0x81e   : > { %v3512_v60 = vadd.f32 %v2127_v56, %v2056_v34  ;;  %v2129_v41 = vpop.f32.mrb[9].mxu1 }
 0x81f   : > { %v3514_v61 = vadd.f32 %v2129_v41, %v2056_v34 }
 0x820   : > { %v2132_v25 = vand.u32 2147483647, %v3512_v60  ;;  %v2135_v48 = vand.u32 2139095040, %v3512_v60  ;;  %vm2134_vm5 = vcmp.lt.s32.totalorder %v3512_v60, 0 }
 0x821   : > { %v2239_v8 = vand.u32 2139095040, %v3514_v61  ;;  %v2236_v58 = vand.u32 2147483647, %v3514_v61 }
 0x822   : > { %v2136_v1 = vshrl.u32 %v2135_v48, 23  ;;  %v2139_v53 = vand.u32 8388607, %v2132_v25 }
 0x823   : > { %v2240_v63 = vshrl.u32 %v2239_v8, 23  ;;  %v2243_v37 = vand.u32 8388607, %v2236_v58 }
 0x824   : > { %v2629_v33 = vadd.s32 4294967169, %v2136_v1  ;;  %v2140_v32 = vor.u32 8388608, %v2139_v53 }
 0x825   : > { %v2633_v7 = vadd.s32 4294967169, %v2240_v63  ;;  %v2244_v13 = vor.u32 8388608, %v2243_v37 }
 0x826   : > { %v2142_v54 = vadd.s32 1, %v2629_v33  ;;  %v3524_v49 = vshll.u32 %v2140_v32, 8 }
 0x827   : > { %v2246_v10 = vadd.s32 1, %v2633_v7 }
 0x828   : > { %vm2143_vm6 = vcmp.gt.s32.totalorder %v2142_v54, 0 }
 0x829   : > { %v2144_v6 = vsel %vm2143_vm6, %v2142_v54, 0  ;;  %vm2247_vm7 = vcmp.gt.s32.totalorder %v2246_v10, 0  ;;  %vm2133_vm6 = vcmp.le.f32.partialorder %v2132_v25, 0.7853982 }
 0x82a   : > { %v2145_v9 = vshrl.u32 %v2144_v6, 5  ;;  %v2146_v12 = vand.u32 31, %v2144_v6  ;;  %v2248_v21 = vsel %vm2247_vm7, %v2246_v10, 0  ;;  %v2284_v10 = vshll.u32 %v2244_v13, 8 }
 0x82b   : > { %v3527_v14 = vshrl.u32 %v2248_v21, 5  ;;  %v2250_v39 = vand.u32 31, %v2248_v21  ;;  %vm2238_vm7 = vcmp.lt.s32.totalorder %v3514_v61, 0 }
 0x82c   : > { %v2147_v17 = vsub.s32 32, %v2146_v12  ;;  %v2149_v15 = vshll.u32 %v2845_v57, %v2146_v12  ;;  %v2152_v2 = vshll.u32 %v2846_v59, %v2146_v12  ;;  %v2155_v11 = vshll.u32 %v2847_v62, %v2146_v12 }
 0x82d   : > { %v2158_v24 = vshll.u32 %v2842_v44, %v2146_v12  ;;  %v2161_v3 = vshll.u32 %v2843_v46, %v2146_v12  ;;  %vm2164_vm8 = vcmp.lt.s32.totalorder %v2145_v9, 1  ;;  %vm2165_vm9 = vcmp.lt.s32.totalorder %v2145_v9, 2 }
 0x82e   : > { %v2150_v26 = vshrl.u32 %v2846_v59, %v2147_v17  ;;  %v2153_v29 = vshrl.u32 %v2847_v62, %v2147_v17  ;;  %v2156_v50 = vshrl.u32 %v2842_v44, %v2147_v17  ;;  %v2148_v38 = vshrl.u32 %v2845_v57, %v2147_v17 }
 0x82f   : > { %v2159_v0 = vshrl.u32 %v2843_v46, %v2147_v17  ;;  %v2162_v23 = vshrl.u32 %v2844_v51, %v2147_v17  ;;  %v2251_v40 = vsub.s32 32, %v2250_v39  ;;  %vm2166_vm10 = vcmp.lt.s32.totalorder %v2145_v9, 3 }
 0x830   : > { %v2151_v20 = vor.u32 %v2150_v26, %v2149_v15  ;;  %v2154_v30 = vor.u32 %v2153_v29, %v2152_v2  ;;  %v2157_v4 = vor.u32 %v2156_v50, %v2155_v11  ;;  %vm2167_vm12 = vcmp.lt.s32.totalorder %v2145_v9, 4 }
 0x831   : > { %v2160_v16 = vor.u32 %v2159_v0, %v2158_v24  ;;  %v2163_v27 = vor.u32 %v2162_v23, %v2161_v3  ;;  %v2253_v52 = vshll.u32 %v2845_v57, %v2250_v39  ;;  %v2254_v31 = vshrl.u32 %v2846_v59, %v2251_v40 }
 0x832   : > { %v2168_v36 = vsel %vm2164_vm8, %v2148_v38, %v2151_v20  ;;  %v2169_v45 = vsel %vm2167_vm12, %v2157_v4, 2102212464  ;;  %v2172_v18 = vsel %vm2164_vm8, %v2151_v20, %v2154_v30  ;;  %v2176_v42 = vsel %vm2164_vm8, %v2154_v30, %v2157_v4 }
 0x833   : > { %v2170_v35 = vsel %vm2166_vm10, %v2154_v30, %v2169_v45  ;;  %v2173_v28 = vsel %vm2167_vm12, %v2160_v16, 920167782  ;;  %v2177_v55 = vsel %vm2167_vm12, %v2163_v27, 1326507024  ;;  %v2256_v22 = vshll.u32 %v2846_v59, %v2250_v39 }
 0x834   : > { %v2174_v19 = vsel %vm2166_vm10, %v2157_v4, %v2173_v28  ;;  %v2178_v43 = vsel %vm2166_vm10, %v2160_v16, %v2177_v55  ;;  %v2171_v47 = vsel %vm2165_vm9, %v2168_v36, %v2170_v35  ;;  %v2257_v41 = vshrl.u32 %v2847_v62, %v2251_v40 }
 0x835   : > { %v2175_v34 = vsel %vm2165_vm9, %v2172_v18, %v2174_v19  ;;  %v2179_v56 = vsel %vm2165_vm9, %v2176_v42, %v2178_v43  ;;  %v2255_v63 = vor.u32 %v2254_v31, %v2253_v52  ;;  %v2259_v59 = vshll.u32 %v2847_v62, %v2250_v39 }
 0x836   : > { %v3550_v48 = vmul.u32.u64.low %v3524_v49, %v2179_v56  ;;  %v3551_v8 = vmul.u32.u64.high %v3524_v49, %v2179_v56, %v3550_v48  ;;  %v3554_v1 = vmul.u32.u64.low %v3524_v49, %v2175_v34  ;;  %v3555_v53 = vmul.u32.u64.high %v3524_v49, %v2175_v34, %v3554_v1 }
 0x837   : > { %v2258_v33 = vor.u32 %v2257_v41, %v2256_v22  ;;  %v2260_v7 = vshrl.u32 %v2842_v44, %v2251_v40  ;;  %v2262_v54 = vshll.u32 %v2842_v44, %v2250_v39  ;;  %v2263_v32 = vshrl.u32 %v2843_v46, %v2251_v40 }
 0x838   : > { %v2266_v37 = vshrl.u32 %v2844_v51, %v2251_v40  ;;  %v2187_v6 = vmul.u32 %v3524_v49, %v2171_v47  ;;  %v2252_v9 = vshrl.u32 %v2845_v57, %v2251_v40  ;;  %v2265_v21 = vshll.u32 %v2843_v46, %v2250_v39 }
 0x839   : > { %v2261_v12 = vor.u32 %v2260_v7, %v2259_v59  ;;  %vm2189_vm13 = vc.u32 %v3551_v8, %v3554_v1  ;;  %v2190_v62 = vadd.s32 1, %v3555_v53  ;;  %v2264_v17 = vor.u32 %v2263_v32, %v2262_v54 }
 0x83a   : > { %vm2268_vm14 = vcmp.lt.s32.totalorder %v3527_v14, 1  ;;  %v2267_v44 = vor.u32 %v2266_v37, %v2265_v21  ;;  %vm2270_vm15 = vcmp.lt.s32.totalorder %v3527_v14, 3  ;;  %vm2271_vm0 = vcmp.lt.s32.totalorder %v3527_v14, 4 }
 0x83b   : > { %v2276_v51 = vsel %vm2268_vm14, %v2255_v63, %v2258_v33  ;;  %v2191_v49 = vsel %vm2189_vm13, %v2190_v62, %v3555_v53  ;;  %v2273_v13 = vsel %vm2271_vm0, %v2261_v12, 2102212464  ;;  %v2277_v57 = vsel %vm2271_vm0, %v2264_v17, 920167782 }
 0x83c   : > { %v2280_v15 = vsel %vm2268_vm14, %v2258_v33, %v2261_v12  ;;  %v2192_v2 = vadd.s32 %v2191_v49, %v2187_v6  ;;  %vm2269_vm1 = vcmp.lt.s32.totalorder %v3527_v14, 2  ;;  %v2278_v46 = vsel %vm2270_vm15, %v2261_v12, %v2277_v57 }
 0x83d   : > { %v2281_v39 = vsel %vm2271_vm0, %v2267_v44, 1326507024  ;;  %v2272_v11 = vsel %vm2268_vm14, %v2252_v9, %v2255_v63  ;;  %v2274_v24 = vsel %vm2270_vm15, %v2258_v33, %v2273_v13  ;;  %v2279_v3 = vsel %vm2269_vm1, %v2276_v51, %v2278_v46 }
 0x83e   : > { %v2282_v26 = vsel %vm2270_vm15, %v2264_v17, %v2281_v39  ;;  %v2193_v29 = vadd.s32 536870912, %v2192_v2  ;;  %v3572_v38 = vmul.u32.u64.low %v2284_v10, %v2279_v3  ;;  %v3573_v0 = vmul.u32.u64.high %v2284_v10, %v2279_v3, %v3572_v38 }
 0x83f   : > { %v2283_v50 = vsel %vm2269_vm1, %v2280_v15, %v2282_v26  ;;  %v2275_v4 = vsel %vm2269_vm1, %v2272_v11, %v2274_v24  ;;  %v2188_v47 = vadd.s32 %v3554_v1, %v3551_v8  ;;  %vm2237_vm8 = vcmp.le.f32.partialorder %v2236_v58, 0.7853982 }
 0x840   : > { %v3575_v23 = vmul.u32.u64.low %v2284_v10, %v2283_v50  ;;  %v3576_v20 = vmul.u32.u64.high %v2284_v10, %v2283_v50, %v3575_v23  ;;  %v2194_v30 = vshrl.u32 %v2193_v29, 30  ;;  %v2294_v16 = vadd.s32 1, %v3573_v0 }
 0x841   : > { %v2291_v14 = vmul.u32 %v2284_v10, %v2275_v4  ;;  %vm2224_vm13 = vweird.f32 %v3512_v60  ;;  %vm2328_vm1 = vweird.f32 %v3514_v61 }
 0x842   : > { %v2195_v40 = vshll.u32 %v2194_v30, 30  ;;  %vm2293_vm2 = vc.u32 %v3576_v20, %v3572_v38  ;;  %v2292_v9 = vadd.s32 %v3572_v38, %v3576_v20  ;;  %v2218_v1 = vsub.s32 4, %v2194_v30 }
 0x843   : > { %v2295_v36 = vsel %vm2293_vm2, %v2294_v16, %v3573_v0 }
 0x844   : > { %v2196_v27 = vsub.s32 %v2192_v2, %v2195_v40  ;;  %v2296_v45 = vadd.s32 %v2295_v36, %v2291_v14  ;;  %v2219_v15 = vsel %vm2134_vm5, %v2218_v1, %v2194_v30 }
 0x845   : > { %v2221_v24 = vsel %vm2133_vm6, 0, %v2219_v15 }
 0x846   : > { %v2198_v18 = vsub.s32 0, %v2196_v27  ;;  %v2297_v42 = vadd.s32 536870912, %v2296_v45  ;;  %v2225_v29 = vadd.s32 3, %v2221_v24 }
 0x848   : > { %v2630_v35 = vmin.u32 %v2198_v18, %v2196_v27  ;;  %v2298_v28 = vshrl.u32 %v2297_v42, 30  ;;  %v2226_v23 = vand.u32 3, %v2225_v29 }
 0x84a   : > { %v2200_v55 = vclz %v2630_v35  ;;  %v2299_v52 = vshll.u32 %v2298_v28, 30  ;;  %v2322_v26 = vsub.s32 4, %v2298_v28  ;;  %vm2231_vm9 = vcmp.eq.s32.totalorder %v2226_v23, 2 }
 0x84b   : > { %vm2228_vm10 = vcmp.eq.s32.totalorder %v2226_v23, 0  ;;  %vm2227_vm12 = vcmp.lt.s32.totalorder %v2226_v23, 2 }
 0x84c   : > { %v2631_v19 = vadd.s32 4294967294, %v2200_v55  ;;  %v2300_v43 = vsub.s32 %v2296_v45, %v2299_v52  ;;  %v2323_v25 = vsel %vm2238_vm7, %v2322_v26, %v2298_v28 }
 0x84d   : > { %v2325_v30 = vsel %vm2237_vm8, 0, %v2323_v25 }
 0x84e   : > { %vm2632_vm3 = vcmp.lt.s32.totalorder %v2631_v19, 0  ;;  %v2302_v22 = vsub.s32 0, %v2300_v43  ;;  %v2329_v14 = vadd.s32 3, %v2325_v30 }
 0x84f   : > { %v2203_v31 = vsel %vm2632_vm3, 0, %v2631_v19 }
 0x850   : > { %v2204_v34 = vsub.s32 32, %v2203_v31  ;;  %v2208_v56 = vsub.s32 4294967266, %v2203_v31  ;;  %v2634_v41 = vmin.u32 %v2302_v22, %v2300_v43  ;;  %v2205_v48 = vshll.u32 %v2196_v27, %v2203_v31  ;;  %v2341_v22 = vld [vmem:[%s3625_s5 + $0x8] sm:$0xff] }
 0x851   : > { %v2330_v18 = vand.u32 3, %v2329_v14 }
 0x852   : > { %v2206_v53 = vshrl.u32 %v2188_v47, %v2204_v34  ;;  %v2209_v63 = vadd.s32 127, %v2208_v56  ;;  %v2304_v33 = vclz %v2634_v41  ;;  %v2347_v47 = vpop.permute.xlu1 %2346 }
 0x853   : > { %vm2335_vm14 = vcmp.eq.s32.totalorder %v2330_v18, 2  ;;  %vm2332_vm15 = vcmp.eq.s32.totalorder %v2330_v18, 0  ;;  %vm2331_vm0 = vcmp.lt.s32.totalorder %v2330_v18, 2 }
 0x854   : > { %v2207_v59 = vor.u32 %v2206_v53, %v2205_v48  ;;  %v2210_v7 = vshll.u32 %v2209_v63, 23  ;;  %v2635_v54 = vadd.s32 4294967294, %v2304_v33  ;;  %v2352_v53 = vpop.permute.xlu0 %2351 }
 0x856   : > { %v2211_v32 = vor.u32 4788187, %v2210_v7  ;;  %vm2636_vm4 = vcmp.lt.s32.totalorder %v2635_v54, 0  ;;  %v2214_v10 = vcvt.s32.f32 %v2207_v59 }
 0x857   : > { %v2307_v6 = vsel %vm2636_vm4, 0, %v2635_v54 }
 0x858   : > { %v2212_v37 = vand.u32 2147483647, %v2211_v32  ;;  %v2308_v12 = vsub.s32 32, %v2307_v6  ;;  %v2312_v21 = vsub.s32 4294967266, %v2307_v6  ;;  %v2309_v62 = vshll.u32 %v2300_v43, %v2307_v6 }
 0x85a   : > { %v2215_v8 = vmul.f32 %v2214_v10, %v2212_v37  ;;  %v2310_v17 = vshrl.u32 %v2292_v9, %v2308_v12  ;;  %v2313_v44 = vadd.s32 127, %v2312_v21 }
 0x85c   : > { %v2216_v51 = vxor.u32 2147483648, %v2215_v8  ;;  %v2311_v49 = vor.u32 %v2310_v17, %v2309_v62  ;;  %v2314_v13 = vshll.u32 %v2313_v44, 23 }
 0x85e   : > { %v2217_v57 = vsel %vm2134_vm5, %v2216_v51, %v2215_v8  ;;  %v2315_v46 = vor.u32 4788187, %v2314_v13  ;;  %v2318_v11 = vcvt.s32.f32 %v2311_v49 }
 0x85f   : > { %v2220_v2 = vsel %vm2133_vm6, %v3512_v60, %v2217_v57  ;;  %v2340_v60 = vld [vmem:[%s3625_s5] sm:$0xff] }
 0x860   : > { %2792 = vcosq.f32 %v2220_v2  ;;  %v2316_v39 = vand.u32 2147483647, %v2315_v46 }
 0x861   : > { %2794 = vsinq.f32 %v2220_v2 }
 0x862   : > { %v2319_v3 = vmul.f32 %v2318_v11, %v2316_v39 }
 0x864   : > { %v2320_v50 = vxor.u32 2147483648, %v2319_v3 }
 0x866   : > { %v2321_v38 = vsel %vm2238_vm7, %v2320_v50, %v2319_v3 }
 0x867   : > { %v2324_v0 = vsel %vm2237_vm8, %v3514_v61, %v2321_v38 }
 0x868   : > { %2796 = vcosq.f32 %v2324_v0 }
 0x869   : > { %2798 = vsinq.f32 %v2324_v0 }
 0x86a   : > { %v2793_v20 = vpop.eup %2792 }
 0x86b   : > { %v2795_v4 = vpop.eup %2794  ;;  %v2232_v40 = vxor.u32 2147483648, %v2793_v20 }
 0x86c   : > { %v2229_v16 = vxor.u32 2147483648, %v2795_v4 }
 0x86d   : > { %v2233_v27 = vsel %vm2231_vm9, %v2232_v40, %v2795_v4 }
 0x86e   : > { %v2230_v36 = vsel %vm2228_vm10, %v2793_v20, %v2229_v16 }
 0x86f   : > { %v2234_v58 = vsel %vm2227_vm12, %v2230_v36, %v2233_v27 }
 0x870   : > { %v2235_v45 = vsel %vm2224_vm13, nan, %v2234_v58 }
 0x872   : > { %v2797_v42 = vpop.eup %2796 }
 0x873   : > { %v2799_v35 = vpop.eup %2798  ;;  %v2336_v28 = vxor.u32 2147483648, %v2797_v42 }
 0x874   : > { %v2333_v55 = vxor.u32 2147483648, %v2799_v35 }
 0x875   : > { %v2337_v52 = vsel %vm2335_vm14, %v2336_v28, %v2799_v35 }
 0x876   : > { %v2334_v19 = vsel %vm2332_vm15, %v2797_v42, %v2333_v55 }
 0x877   : > { %v2338_v43 = vsel %vm2331_vm0, %v2334_v19, %v2337_v52 }
 0x878   : > { %v2339_v31 = vsel %vm2328_vm1, nan, %v2338_v43 }
 0x879   : > { %2360 = vmatprep.subr.mxu0 %v2339_v31 }
 0x87a   : > { %2361 = vmatpush1.msra.mxu0 %v2235_v45 }
 0x87b   : > { %2637 = vmatmul.mubr.msk.f32.vlgmr.msra.gmra.mrb[4].mxu0 %vm602_vm11, %v2340_v60 }
 0x87c   : > { %2430 = vmatprep.mubr.f32.mxu0 %v2840_v5 }
 0x87f   : > { %2638 = vmatmul.mubr.msk.f32.gmra.mrb[6].mxu0 %vm602_vm11, %v2341_v22 }
 0x94e   : > { %v2426_v61 = vpop.f32.mrb[4].mxu0 }
 0x94f   : > { %v2427_v34 = vadd.f32 %v2426_v61, %v2347_v47  ;;  %v2428_v56 = vpop.f32.mrb[5].mxu0 }
 0x950   : > { %v2429_v41 = vadd.f32 %v2428_v56, %v2347_v47 }
 0x951   : > { %v2639_v48 = vmul.f32 -1.442695, %v2427_v34 }
 0x952   : > { %v2640_v63 = vmul.f32 -1.442695, %v2429_v41  ;;  %v2432_v33 = vpop.f32.mrb[6].mxu0 }
 0x953   : > { %2800 = vpow2.f32 %v2639_v48  ;;  %v2433_v59 = vadd.f32 %v2432_v33, %v2352_v53  ;;  %v2434_v7 = vpop.f32.mrb[7].mxu0 }
 0x954   : > { %2802 = vpow2.f32 %v2640_v63  ;;  %v2435_v5 = vadd.f32 %v2434_v7, %v2352_v53 }
 0x955   : > { %v2641_v54 = vmul.f32 -1.442695, %v2433_v59 }
 0x956   : > { %v2642_v32 = vmul.f32 -1.442695, %v2435_v5 }
 0x957   : > { %2804 = vpow2.f32 %v2641_v54 }
 0x958   : > { %2806 = vpow2.f32 %v2642_v32 }
 0x95d   : > { %v2801_v37 = vpop.eup %2800 }
 0x95e   : > { %v2803_v10 = vpop.eup %2802  ;;  %v2449_v6 = vadd.f32 1.0, %v2801_v37 }
 0x95f   : > { %v2450_v9 = vadd.f32 1.0, %v2803_v10 }
 0x960   : > { %2808 = vrcp.f32 %v2449_v6 }
 0x961   : > { %v2805_v12 = vpop.eup %2804  ;;  %2810 = vrcp.f32 %v2450_v9 }
 0x962   : > { %v2807_v21 = vpop.eup %2806  ;;  %v2451_v8 = vadd.f32 1.0, %v2805_v12 }
 0x963   : > { %v2452_v1 = vadd.f32 1.0, %v2807_v21 }
 0x964   : > { %2812 = vrcp.f32 %v2451_v8 }
 0x965   : > { %2814 = vrcp.f32 %v2452_v1 }
 0x96a   : > { %v2809_v62 = vpop.eup %2808  ;;  %2471 = sbr.rel (!%p2918_p5) target bundleno = 2425 (0x979), region = 75 }
 0x96b   : > { %v2811_v17 = vpop.eup %2810  ;;  %2461 = vst [vmem:[%s298_s24] sm:$0xff] %v2809_v62 }
 0x96c   : > { %2462 = vst [vmem:[%s298_s24 + $0x8] sm:$0xff] %v2811_v17 }
 0x96e   : > { %v2813_v44 = vpop.eup %2812 }
 0x96f   : > { %v2815_v51 = vpop.eup %2814  ;;  %2463 = vst [vmem:[%s298_s24 + $0x10] sm:$0xff] %v2813_v44 }
 0x970   : > { %2464 = vst [vmem:[%s298_s24 + $0x18] sm:$0xff] %v2815_v51 }
 0x972   : > { %v2487_v49 = vld [vmem:[%s298_s24] sm:$0xff] }
 0x973   : > { %v2489_v13 = vld [vmem:[%s298_s24 + $0x8] sm:$0xff]  ;;  %2488 = vst [vmem:[%s2474_s11] sm:$0xff] %v2487_v49 }
 0x974   : > { %2490 = vst [vmem:[%s2474_s11 + $0x8] sm:$0xff] %v2489_v13 }
 0x976   : > { %v2491_v57 = vld [vmem:[%s298_s24 + $0x10] sm:$0xff] }
 0x977   : > { %v2493_v15 = vld [vmem:[%s298_s24 + $0x18] sm:$0xff]  ;;  %2492 = vst [vmem:[%s2474_s11 + $0x20] sm:$0xff] %v2491_v57 }
 0x978   : > { %2494 = vst [vmem:[%s2474_s11 + $0x28] sm:$0xff] %v2493_v15 }
 0x979 PF: > { %p14_p10 = scmp.ge.s32.totalorder %s2905_s28, 4   ;;  %s3629_s24 = smov %s2834_s25 }
 0x97a   : > { %s3630_s25 = smov %s2916_s8  ;;  %s3631_s26 = smov %s2905_s28 }
 0x97b   :  { %16 = sbr.rel (!%p14_p10) target bundleno = 2 (0x2), region = 139 }

</bundles_post_ra>
